<compile_context>
chip_gen: v7x
topology: tpu7x:2x2x1
jax: 0.10.0
libtpu: 0.0.40
codegen_flags: <defaults>
</compile_context>

<pallas_src>
import functools

import jax
import jax.numpy as jnp
from jax import lax
from jax.experimental import pallas as pl
from jax.experimental.pallas import tpu as pltpu

BN_EPS = 1e-5
_STAGE_PAD = 128      # lane offset of the stage interior -> tile-aligned store


# ------------------------------ kernel helpers ------------------------------ #

def _bn(y, g, be):
    """Train-mode BatchNorm on (C, P): per-row (per-channel) stats over pixels.

    Two-pass (centered) variance for numerical robustness.
    """
    inv_cnt = 1.0 / float(y.shape[1])
    mean = jnp.sum(y, axis=1, keepdims=True) * inv_cnt
    c = y - mean
    var = jnp.sum(c * c, axis=1, keepdims=True) * inv_cnt
    return c * (lax.rsqrt(var + BN_EPS) * g) + be


def _im2col_s1(x, keep, stage_ref, patch_ref, C, W, P):
    """3x3 stride-1 'same' im2col in (C, P) layout.

    x: (C, P) value.  stage_ref: (C, _STAGE_PAD + P + W + 1) VMEM.
    patch_ref: (9*C, P) VMEM.  keep = (h0, hL, w0, wL) lane masks (1, P), 1.0
    where the neighbour in that direction exists (edge pixels -> 0.0).
    Tap (kh, kw) is the flat pixel axis shifted by (kh-1)*W + (kw-1); edge
    masks zero the row/image-wrap positions, halo strips supply the rest.
    """
    kh0, khL, kw0, kwL = keep
    L = _STAGE_PAD
    # Zero only the halo strips actually read (not the whole buffer).
    stage_ref[:, L - (W + 1):L] = jnp.zeros((C, W + 1), jnp.float32)
    stage_ref[:, L + P:L + P + W + 1] = jnp.zeros((C, W + 1), jnp.float32)
    stage_ref[:, L:L + P] = x                      # 128-aligned interior store
    for kh in range(3):
        for kw in range(3):
            off = (kh - 1) * W + (kw - 1)
            tap = stage_ref[:, L + off:L + off + P]
            m = None
            if kh == 0:
                m = kh0
            elif kh == 2:
                m = khL
            if kw == 0:
                m = kw0 if m is None else m * kw0
            elif kw == 2:
                m = kwL if m is None else m * kwL
            if m is not None:
                tap = tap * m
            t = kh * 3 + kw
            patch_ref[t * C:(t + 1) * C, :] = tap


def _im2col_s2(xds_ref, keep, stage_ref, patch_ref, Cin, Wo, P):
    """3x3 stride-2 pad-1 im2col from 4 parity planes stacked as (4*Cin, P).

    Plane q = hp*2 + wp holds x[:, :, hp::2, wp::2] flattened to (Cin, P).
    Output pixel (ho, wo), tap kh: input row 2*ho + kh - 1 lives in the even
    plane (kh==1, row ho) or the odd plane (kh==0 -> row ho-1, kh==2 -> row
    ho); same for columns.  Only left shifts {0, 1, Wo, Wo+1} are needed.
    """
    kh0, _, kw0, _ = keep
    L = _STAGE_PAD
    stage_ref[:, L - (Wo + 1):L] = jnp.zeros((4 * Cin, Wo + 1), jnp.float32)
    stage_ref[:, L:L + P] = xds_ref[...]
    for kh in range(3):
        hp, sh = (0, 0) if kh == 1 else (1, 1 if kh == 0 else 0)
        for kw in range(3):
            wp, sw = (0, 0) if kw == 1 else (1, 1 if kw == 0 else 0)
            q = hp * 2 + wp
            s = sh * Wo + sw
            tap = stage_ref[q * Cin:(q + 1) * Cin, L - s:L - s + P]
            m = None
            if sh:
                m = kh0
            if sw:
                m = kw0 if m is None else m * kw0
            if m is not None:
                tap = tap * m
            t = kh * 3 + kw
            patch_ref[t * Cin:(t + 1) * Cin, :] = tap


# ----------------------------- fused block kernels --------------------------- #

def _residual_same_kernel(W, C, P,
                          x_ref, edge_ref, w1_ref, g1_ref, be1_ref,
                          w2_ref, g2_ref, be2_ref,
                          out_ref, stage_ref, patch_ref):
    keep = (edge_ref[0:1, :], edge_ref[1:2, :], edge_ref[2:3, :], edge_ref[3:4, :])
    x = x_ref[...]

    # conv1 (3x3, s1, p1) -> bn1 -> relu     (one im2col matmul, K = 9*C)
    _im2col_s1(x, keep, stage_ref, patch_ref, C, W, P)
    acc1 = jnp.dot(w1_ref[...], patch_ref[...], preferred_element_type=jnp.float32)
    h1 = jnp.maximum(_bn(acc1, g1_ref[...], be1_ref[...]), 0.0)

    # conv2 (3x3, s1, p1) -> bn2 -> +identity skip -> relu
    _im2col_s1(h1, keep, stage_ref, patch_ref, C, W, P)
    acc2 = jnp.dot(w2_ref[...], patch_ref[...], preferred_element_type=jnp.float32)
    out_ref[...] = jnp.maximum(_bn(acc2, g2_ref[...], be2_ref[...]) + x, 0.0)


def _residual_down_kernel(Wo, Cin, Cout, P,
                          xds_ref, edge_ref, w1_ref, g1_ref, be1_ref,
                          w2_ref, g2_ref, be2_ref, w3_ref, b3_ref,
                          out_ref, stage1_ref, stage2_ref, patch1_ref, patch2_ref):
    keep = (edge_ref[0:1, :], edge_ref[1:2, :], edge_ref[2:3, :], edge_ref[3:4, :])

    # conv1 (3x3, stride 2, pad 1) via parity planes -> bn1 -> relu
    _im2col_s2(xds_ref, keep, stage1_ref, patch1_ref, Cin, Wo, P)
    acc1 = jnp.dot(w1_ref[...], patch1_ref[...], preferred_element_type=jnp.float32)
    h1 = jnp.maximum(_bn(acc1, g1_ref[...], be1_ref[...]), 0.0)

    # conv2 (3x3, stride 1, pad 1) -> bn2
    _im2col_s1(h1, keep, stage2_ref, patch2_ref, Cout, Wo, P)
    acc2 = jnp.dot(w2_ref[...], patch2_ref[...], preferred_element_type=jnp.float32)
    bn2 = _bn(acc2, g2_ref[...], be2_ref[...])

    # 1x1 stride-2 skip conv: its input is exactly the even/even parity plane.
    skip = jnp.dot(w3_ref[...], xds_ref[0:Cin, :],
                   preferred_element_type=jnp.float32) + b3_ref[...]
    out_ref[...] = jnp.maximum(bn2 + skip, 0.0)


# ------------------------------ pallas_call glue ----------------------------- #

def _full_spec(shape):
    nd = len(shape)
    return pl.BlockSpec(shape, lambda i, _nd=nd: (0,) * _nd)


def _fused_call(kernel, out_shape, scratch_shapes, *arrays):
    # Everything fits comfortably in VMEM -> single grid step, one launch.
    return pl.pallas_call(
        kernel,
        out_shape=jax.ShapeDtypeStruct(out_shape, jnp.float32),
        grid=(1,),
        in_specs=[_full_spec(a.shape) for a in arrays],
        out_specs=_full_spec(out_shape),
        scratch_shapes=scratch_shapes,
        compiler_params=pltpu.CompilerParams(
            dimension_semantics=("arbitrary",),
            vmem_limit_bytes=32 * 1024 * 1024),
    )(*arrays)


# ------------------------------ Residual block ------------------------------- #

def init_params(key, inc, outc, same_shape):
    ks = jax.random.split(key, 10)

    def conv_w(k, co, ci, kh, kw):                  # PyTorch OIHW layout
        fan_in = float(ci * kh * kw)
        return jax.random.normal(k, (co, ci, kh, kw), jnp.float32) / jnp.sqrt(fan_in)

    p = {
        "w1": conv_w(ks[0], outc, inc, 3, 3),
        "b1": 0.01 * jax.random.normal(ks[1], (outc,), jnp.float32),
        "g1": 1.0 + 0.1 * jax.random.normal(ks[2], (outc,), jnp.float32),
        "be1": 0.1 * jax.random.normal(ks[3], (outc,), jnp.float32),
        "w2": conv_w(ks[4], outc, outc, 3, 3),
        "b2": 0.01 * jax.random.normal(ks[5], (outc,), jnp.float32),
        "g2": 1.0 + 0.1 * jax.random.normal(ks[6], (outc,), jnp.float32),
        "be2": 0.1 * jax.random.normal(ks[7], (outc,), jnp.float32),
    }
    if not same_shape:
        p["w3"] = conv_w(ks[8], outc, inc, 1, 1)
        p["b3"] = 0.01 * jax.random.normal(ks[9], (outc,), jnp.float32)
    return p


def _edge_masks(n, h, w):
    """(4, N*H*W) float32 keep-masks: rows = [h>0, h<H-1, w>0, w<W-1]."""
    p = jnp.arange(n * h * w, dtype=jnp.int32)
    hh = (p // w) % h
    ww = p % w
    keep = jnp.stack([hh != 0, hh != h - 1, ww != 0, ww != w - 1])
    return keep.astype(jnp.float32)


def _w_mat(wk):
    """OIHW (Co,Ci,kh,kw) -> (Co, kh*kw*Ci), tap-major / channel-minor."""
    co, ci, kh, kw = wk.shape
    return jnp.transpose(wk, (0, 2, 3, 1)).reshape(co, kh * kw * ci)


def _col(v):
    return v.reshape(-1, 1)


def residual_forward(x_nchw, params, same_shape):
    """x: (N, Cin, H, W) f32 -> (N, Cout, H', W') f32, one fused Pallas kernel."""
    n, cin, h, w = x_nchw.shape
    cout = params["w1"].shape[0]
    assert w + 1 <= _STAGE_PAD and (w // 2) + 1 <= _STAGE_PAD

    if same_shape:
        assert cin == cout
        p = n * h * w
        x_cp = jnp.transpose(x_nchw, (1, 0, 2, 3)).reshape(cin, p)   # lane-dense
        edge = _edge_masks(n, h, w)
        kern = functools.partial(_residual_same_kernel, w, cin, p)
        scratch = [pltpu.VMEM((cin, _STAGE_PAD + p + w + 1), jnp.float32),  # stage
                   pltpu.VMEM((9 * cin, p), jnp.float32)]                   # im2col
        out_cp = _fused_call(
            kern, (cout, p), scratch,
            x_cp, edge,
            _w_mat(params["w1"]), _col(params["g1"]), _col(params["be1"]),
            _w_mat(params["w2"]), _col(params["g2"]), _col(params["be2"]))
        return jnp.transpose(out_cp.reshape(cout, n, h, w), (1, 0, 2, 3))

    assert h % 2 == 0 and w % 2 == 0
    ho, wo = h // 2, w // 2
    p = n * ho * wo
    x_chw = jnp.transpose(x_nchw, (1, 0, 2, 3))
    planes = [x_chw[:, :, hp::2, wp::2].reshape(cin, p)
              for hp in (0, 1) for wp in (0, 1)]                     # parity split
    xds = jnp.concatenate(planes, axis=0)                            # (4*Cin, P)
    edge = _edge_masks(n, ho, wo)
    kern = functools.partial(_residual_down_kernel, wo, cin, cout, p)
    scratch = [pltpu.VMEM((4 * cin, _STAGE_PAD + p), jnp.float32),          # stage1
               pltpu.VMEM((cout, _STAGE_PAD + p + wo + 1), jnp.float32),    # stage2
               pltpu.VMEM((9 * cin, p), jnp.float32),                       # im2col1
               pltpu.VMEM((9 * cout, p), jnp.float32)]                      # im2col2
    out_cp = _fused_call(
        kern, (cout, p), scratch,
        xds, edge,
        _w_mat(params["w1"]), _col(params["g1"]), _col(params["be1"]),
        _w_mat(params["w2"]), _col(params["g2"]), _col(params["be2"]),
        params["w3"].reshape(cout, cin), _col(params["b3"]))
    return jnp.transpose(out_cp.reshape(cout, n, ho, wo), (1, 0, 2, 3))


def residual_ref(x, params, same_shape):
    """Pure-JAX reference (mirrors PyTorch Residual.forward in train mode)."""
    dn = ("NCHW", "OIHW", "NCHW")

    def conv(xx, ww, bb, stride, pad):
        y = lax.conv_general_dilated(xx, ww, (stride, stride),
                                     padding=[(pad, pad), (pad, pad)],
                                     dimension_numbers=dn,
                                     precision=lax.Precision.HIGHEST)
        return y + bb.reshape(1, -1, 1, 1)

    def bn(y, g, be):
        mean = jnp.mean(y, axis=(0, 2, 3), keepdims=True)
        var = jnp.mean((y - mean) ** 2, axis=(0, 2, 3), keepdims=True)
        return ((y - mean) * lax.rsqrt(var + BN_EPS) * g.reshape(1, -1, 1, 1)
                + be.reshape(1, -1, 1, 1))

    s = 1 if same_shape else 2
    out = jax.nn.relu(bn(conv(x, params["w1"], params["b1"], s, 1),
                         params["g1"], params["be1"]))
    out = bn(conv(out, params["w2"], params["b2"], 1, 1),
             params["g2"], params["be2"])
    skip = x if same_shape else conv(x, params["w3"], params["b3"], s, 0)
    return jax.nn.relu(out + skip)


# ----------------------------------- main ------------------------------------ #

if __name__ == "__main__":
    # NOTE: at N=2, H=W=16, C=4/8 this kernel is fixed-overhead bound; the
    # structural choices above target the layout/copy costs that matter here
    # and the MXU/VMEM behaviour that matters at real ResNet sizes.
    key = jax.random.PRNGKey(0)
    kx, kp1, kp2 = jax.random.split(key, 3)

    x = jax.random.normal(kx, (2, 4, 16, 16), jnp.float32)    # PyTorch NCHW

    # Case 1: same_shape=True (inc == outc == 4, stride 1, identity skip).
    p1 = init_params(kp1, 4, 4, True)
    out1 = jax.block_until_ready(residual_forward(x, p1, True))
    ref1 = residual_ref(x, p1, True)
    assert out1.shape == (2, 4, 16, 16)
    assert float(jnp.max(jnp.abs(out1 - ref1))) < 2e-3

    # Case 2: same_shape=False (inc=4 -> outc=8, stride 2, 1x1-conv skip).
    p2 = init_params(kp2, 4, 8, False)
    out2 = jax.block_until_ready(residual_forward(x, p2, False))
    ref2 = residual_ref(x, p2, False)
    assert out2.shape == (2, 8, 8, 8)
    assert float(jnp.max(jnp.abs(out2 - ref2))) < 2e-3

    print("KERNEL_OK")
</pallas_src>

<mosaic_0001>
module attributes {stable_mosaic.version = 11 : i64} {
  func.func @_residual_same_kernel(%arg0: i32, %arg1: memref<4x512xf32, #tpu.memory_space<vmem>>, %arg2: memref<4x512xf32, #tpu.memory_space<vmem>>, %arg3: memref<4x36xf32, #tpu.memory_space<vmem>>, %arg4: memref<4x1xf32, #tpu.memory_space<vmem>>, %arg5: memref<4x1xf32, #tpu.memory_space<vmem>>, %arg6: memref<4x36xf32, #tpu.memory_space<vmem>>, %arg7: memref<4x1xf32, #tpu.memory_space<vmem>>, %arg8: memref<4x1xf32, #tpu.memory_space<vmem>>, %arg9: memref<4x512xf32, #tpu.memory_space<vmem>>, %arg10: memref<4x657xf32, #tpu.memory_space<vmem>>, %arg11: memref<36x512xf32, #tpu.memory_space<vmem>>) attributes {dimension_semantics = [#tpu.dimension_semantics<arbitrary>], iteration_bounds = array<i64: 1>, scalar_prefetch = 0 : i64, scratch_operands = 2 : i64, tpu.core_type = #tpu.core_type<tc>, window_params = [{pipeline_mode = #tpu.pipeline_mode<synchronous>, transform_indices = @transform_0, window_bounds = array<i64: 4, 512>}, {pipeline_mode = #tpu.pipeline_mode<synchronous>, transform_indices = @transform_1, window_bounds = array<i64: 4, 512>}, {pipeline_mode = #tpu.pipeline_mode<synchronous>, transform_indices = @transform_2, window_bounds = array<i64: 4, 36>}, {pipeline_mode = #tpu.pipeline_mode<synchronous>, transform_indices = @transform_3, window_bounds = array<i64: 4, 1>}, {pipeline_mode = #tpu.pipeline_mode<synchronous>, transform_indices = @transform_4, window_bounds = array<i64: 4, 1>}, {pipeline_mode = #tpu.pipeline_mode<synchronous>, transform_indices = @transform_5, window_bounds = array<i64: 4, 36>}, {pipeline_mode = #tpu.pipeline_mode<synchronous>, transform_indices = @transform_6, window_bounds = array<i64: 4, 1>}, {pipeline_mode = #tpu.pipeline_mode<synchronous>, transform_indices = @transform_7, window_bounds = array<i64: 4, 1>}, {pipeline_mode = #tpu.pipeline_mode<synchronous>, transform_indices = @transform_8, window_bounds = array<i64: 4, 512>}]} {
    %c0 = arith.constant 0 : index
    %c0_0 = arith.constant 0 : index
    %0 = vector.load %arg2[%c0, %c0_0] : memref<4x512xf32, #tpu.memory_space<vmem>>, vector<1x512xf32>
    %c1 = arith.constant 1 : index
    %c0_1 = arith.constant 0 : index
    %1 = vector.load %arg2[%c1, %c0_1] : memref<4x512xf32, #tpu.memory_space<vmem>>, vector<1x512xf32>
    %c2 = arith.constant 2 : index
    %c0_2 = arith.constant 0 : index
    %2 = vector.load %arg2[%c2, %c0_2] : memref<4x512xf32, #tpu.memory_space<vmem>>, vector<1x512xf32>
    %c3 = arith.constant 3 : index
    %c0_3 = arith.constant 0 : index
    %3 = vector.load %arg2[%c3, %c0_3] : memref<4x512xf32, #tpu.memory_space<vmem>>, vector<1x512xf32>
    %c0_4 = arith.constant 0 : index
    %c0_5 = arith.constant 0 : index
    %4 = vector.load %arg1[%c0_4, %c0_5] : memref<4x512xf32, #tpu.memory_space<vmem>>, vector<4x512xf32>
    %cst = arith.constant 0.000000e+00 : f32
    %5 = vector.broadcast %cst : f32 to vector<4x17xf32>
    %c0_6 = arith.constant 0 : index
    %c111 = arith.constant 111 : index
    %6 = vector.load %arg10[%c0_6, %c111] : memref<4x657xf32, #tpu.memory_space<vmem>>, vector<4x17xf32>
    tpu.vector_store %arg10[%c0_6, %c111], %5 {strides = array<i32>} : memref<4x657xf32, #tpu.memory_space<vmem>>, vector<4x17xf32>,
    %cst_7 = arith.constant 0.000000e+00 : f32
    %7 = vector.broadcast %cst_7 : f32 to vector<4x17xf32>
    %c0_8 = arith.constant 0 : index
    %c640 = arith.constant 640 : index
    %8 = vector.load %arg10[%c0_8, %c640] : memref<4x657xf32, #tpu.memory_space<vmem>>, vector<4x17xf32>
    tpu.vector_store %arg10[%c0_8, %c640], %7 {strides = array<i32>} : memref<4x657xf32, #tpu.memory_space<vmem>>, vector<4x17xf32>,
    %c0_9 = arith.constant 0 : index
    %c128 = arith.constant 128 : index
    %9 = vector.load %arg10[%c0_9, %c128] : memref<4x657xf32, #tpu.memory_space<vmem>>, vector<4x512xf32>
    tpu.vector_store %arg10[%c0_9, %c128], %4 {strides = array<i32>} : memref<4x657xf32, #tpu.memory_space<vmem>>, vector<4x512xf32>,
    %c0_10 = arith.constant 0 : index
    %c111_11 = arith.constant 111 : index
    %10 = vector.load %arg10[%c0_10, %c111_11] : memref<4x657xf32, #tpu.memory_space<vmem>>, vector<4x512xf32>
    %11 = arith.mulf %0, %2 : vector<1x512xf32>
    %12 = vector.broadcast %11 : vector<1x512xf32> to vector<4x512xf32>
    %13 = arith.mulf %10, %12 : vector<4x512xf32>
    %c0_12 = arith.constant 0 : index
    %c0_13 = arith.constant 0 : index
    %14 = vector.load %arg11[%c0_12, %c0_13] : memref<36x512xf32, #tpu.memory_space<vmem>>, vector<4x512xf32>
    tpu.vector_store %arg11[%c0_12, %c0_13], %13 {strides = array<i32>} : memref<36x512xf32, #tpu.memory_space<vmem>>, vector<4x512xf32>,
    %c0_14 = arith.constant 0 : index
    %c112 = arith.constant 112 : index
    %15 = vector.load %arg10[%c0_14, %c112] : memref<4x657xf32, #tpu.memory_space<vmem>>, vector<4x512xf32>
    %16 = vector.broadcast %0 : vector<1x512xf32> to vector<4x512xf32>
    %17 = arith.mulf %15, %16 : vector<4x512xf32>
    %c4 = arith.constant 4 : index
    %c0_15 = arith.constant 0 : index
    %18 = vector.load %arg11[%c4, %c0_15] : memref<36x512xf32, #tpu.memory_space<vmem>>, vector<4x512xf32>
    tpu.vector_store %arg11[%c4, %c0_15], %17 {strides = array<i32>} : memref<36x512xf32, #tpu.memory_space<vmem>>, vector<4x512xf32>,
    %c0_16 = arith.constant 0 : index
    %c113 = arith.constant 113 : index
    %19 = vector.load %arg10[%c0_16, %c113] : memref<4x657xf32, #tpu.memory_space<vmem>>, vector<4x512xf32>
    %20 = arith.mulf %0, %3 : vector<1x512xf32>
    %21 = vector.broadcast %20 : vector<1x512xf32> to vector<4x512xf32>
    %22 = arith.mulf %19, %21 : vector<4x512xf32>
    %c8 = arith.constant 8 : index
    %c0_17 = arith.constant 0 : index
    %23 = vector.load %arg11[%c8, %c0_17] : memref<36x512xf32, #tpu.memory_space<vmem>>, vector<4x512xf32>
    tpu.vector_store %arg11[%c8, %c0_17], %22 {strides = array<i32>} : memref<36x512xf32, #tpu.memory_space<vmem>>, vector<4x512xf32>,
    %c0_18 = arith.constant 0 : index
    %c127 = arith.constant 127 : index
    %24 = vector.load %arg10[%c0_18, %c127] : memref<4x657xf32, #tpu.memory_space<vmem>>, vector<4x512xf32>
    %25 = vector.broadcast %2 : vector<1x512xf32> to vector<4x512xf32>
    %26 = arith.mulf %24, %25 : vector<4x512xf32>
    %c12 = arith.constant 12 : index
    %c0_19 = arith.constant 0 : index
    %27 = vector.load %arg11[%c12, %c0_19] : memref<36x512xf32, #tpu.memory_space<vmem>>, vector<4x512xf32>
    tpu.vector_store %arg11[%c12, %c0_19], %26 {strides = array<i32>} : memref<36x512xf32, #tpu.memory_space<vmem>>, vector<4x512xf32>,
    %c0_20 = arith.constant 0 : index
    %c128_21 = arith.constant 128 : index
    %28 = vector.load %arg10[%c0_20, %c128_21] : memref<4x657xf32, #tpu.memory_space<vmem>>, vector<4x512xf32>
    %c16 = arith.constant 16 : index
    %c0_22 = arith.constant 0 : index
    %29 = vector.load %arg11[%c16, %c0_22] : memref<36x512xf32, #tpu.memory_space<vmem>>, vector<4x512xf32>
    tpu.vector_store %arg11[%c16, %c0_22], %28 {strides = array<i32>} : memref<36x512xf32, #tpu.memory_space<vmem>>, vector<4x512xf32>,
    %c0_23 = arith.constant 0 : index
    %c129 = arith.constant 129 : index
    %30 = vector.load %arg10[%c0_23, %c129] : memref<4x657xf32, #tpu.memory_space<vmem>>, vector<4x512xf32>
    %31 = vector.broadcast %3 : vector<1x512xf32> to vector<4x512xf32>
    %32 = arith.mulf %30, %31 : vector<4x512xf32>
    %c20 = arith.constant 20 : index
    %c0_24 = arith.constant 0 : index
    %33 = vector.load %arg11[%c20, %c0_24] : memref<36x512xf32, #tpu.memory_space<vmem>>, vector<4x512xf32>
    tpu.vector_store %arg11[%c20, %c0_24], %32 {strides = array<i32>} : memref<36x512xf32, #tpu.memory_space<vmem>>, vector<4x512xf32>,
    %c0_25 = arith.constant 0 : index
    %c143 = arith.constant 143 : index
    %34 = vector.load %arg10[%c0_25, %c143] : memref<4x657xf32, #tpu.memory_space<vmem>>, vector<4x512xf32>
    %35 = arith.mulf %1, %2 : vector<1x512xf32>
    %36 = vector.broadcast %35 : vector<1x512xf32> to vector<4x512xf32>
    %37 = arith.mulf %34, %36 : vector<4x512xf32>
    %c24 = arith.constant 24 : index
    %c0_26 = arith.constant 0 : index
    %38 = vector.load %arg11[%c24, %c0_26] : memref<36x512xf32, #tpu.memory_space<vmem>>, vector<4x512xf32>
    tpu.vector_store %arg11[%c24, %c0_26], %37 {strides = array<i32>} : memref<36x512xf32, #tpu.memory_space<vmem>>, vector<4x512xf32>,
    %c0_27 = arith.constant 0 : index
    %c144 = arith.constant 144 : index
    %39 = vector.load %arg10[%c0_27, %c144] : memref<4x657xf32, #tpu.memory_space<vmem>>, vector<4x512xf32>
    %40 = vector.broadcast %1 : vector<1x512xf32> to vector<4x512xf32>
    %41 = arith.mulf %39, %40 : vector<4x512xf32>
    %c28 = arith.constant 28 : index
    %c0_28 = arith.constant 0 : index
    %42 = vector.load %arg11[%c28, %c0_28] : memref<36x512xf32, #tpu.memory_space<vmem>>, vector<4x512xf32>
    tpu.vector_store %arg11[%c28, %c0_28], %41 {strides = array<i32>} : memref<36x512xf32, #tpu.memory_space<vmem>>, vector<4x512xf32>,
    %c0_29 = arith.constant 0 : index
    %c145 = arith.constant 145 : index
    %43 = vector.load %arg10[%c0_29, %c145] : memref<4x657xf32, #tpu.memory_space<vmem>>, vector<4x512xf32>
    %44 = arith.mulf %1, %3 : vector<1x512xf32>
    %45 = vector.broadcast %44 : vector<1x512xf32> to vector<4x512xf32>
    %46 = arith.mulf %43, %45 : vector<4x512xf32>
    %c32 = arith.constant 32 : index
    %c0_30 = arith.constant 0 : index
    %47 = vector.load %arg11[%c32, %c0_30] : memref<36x512xf32, #tpu.memory_space<vmem>>, vector<4x512xf32>
    tpu.vector_store %arg11[%c32, %c0_30], %46 {strides = array<i32>} : memref<36x512xf32, #tpu.memory_space<vmem>>, vector<4x512xf32>,
    %c0_31 = arith.constant 0 : index
    %c0_32 = arith.constant 0 : index
    %48 = vector.load %arg3[%c0_31, %c0_32] : memref<4x36xf32, #tpu.memory_space<vmem>>, vector<4x36xf32>
    %c0_33 = arith.constant 0 : index
    %c0_34 = arith.constant 0 : index
    %49 = vector.load %arg11[%c0_33, %c0_34] : memref<36x512xf32, #tpu.memory_space<vmem>>, vector<36x512xf32>
    %cst_35 = arith.constant dense<0.000000e+00> : vector<4x512xf32>
    %50 = tpu.matmul %48, %49, %cst_35 {dimension_numbers = #tpu.dot_dimension_numbers<[1], [0], [0], [1], [0, 0, 1, 1], [], []>} : vector<4x36xf32>, vector<36x512xf32>, vector<4x512xf32> -> vector<4x512xf32>
    %c0_36 = arith.constant 0 : index
    %c0_37 = arith.constant 0 : index
    %51 = vector.load %arg4[%c0_36, %c0_37] : memref<4x1xf32, #tpu.memory_space<vmem>>, vector<4x1xf32>
    %c0_38 = arith.constant 0 : index
    %c0_39 = arith.constant 0 : index
    %52 = vector.load %arg5[%c0_38, %c0_39] : memref<4x1xf32, #tpu.memory_space<vmem>>, vector<4x1xf32>
    %cst_40 = arith.constant dense<0.000000e+00> : vector<4xf32>
    %53 = vector.multi_reduction <add>, %50, %cst_40 [1] : vector<4x512xf32> to vector<4xf32>
    %54 = vector.shape_cast %53 : vector<4xf32> to vector<4x1xf32>
    %cst_41 = arith.constant 0.001953125 : f32
    %55 = vector.broadcast %cst_41 : f32 to vector<4x1xf32>
    %56 = arith.mulf %54, %55 : vector<4x1xf32>
    %57 = vector.broadcast %56 : vector<4x1xf32> to vector<4x512xf32>
    %58 = arith.subf %50, %57 : vector<4x512xf32>
    %59 = arith.mulf %58, %58 : vector<4x512xf32>
    %cst_42 = arith.constant dense<0.000000e+00> : vector<4xf32>
    %60 = vector.multi_reduction <add>, %59, %cst_42 [1] : vector<4x512xf32> to vector<4xf32>
    %61 = vector.shape_cast %60 : vector<4xf32> to vector<4x1xf32>
    %cst_43 = arith.constant 0.001953125 : f32
    %62 = vector.broadcast %cst_43 : f32 to vector<4x1xf32>
    %63 = arith.mulf %61, %62 : vector<4x1xf32>
    %cst_44 = arith.constant 9.99999974E-6 : f32
    %64 = vector.broadcast %cst_44 : f32 to vector<4x1xf32>
    %65 = arith.addf %63, %64 : vector<4x1xf32>
    %66 = math.rsqrt %65 : vector<4x1xf32>
    %67 = arith.mulf %66, %51 : vector<4x1xf32>
    %68 = vector.broadcast %67 : vector<4x1xf32> to vector<4x512xf32>
    %69 = arith.mulf %58, %68 : vector<4x512xf32>
    %70 = vector.broadcast %52 : vector<4x1xf32> to vector<4x512xf32>
    %71 = arith.addf %69, %70 : vector<4x512xf32>
    %cst_45 = arith.constant 0.000000e+00 : f32
    %72 = vector.broadcast %cst_45 : f32 to vector<4x512xf32>
    %73 = arith.maximumf %71, %72 : vector<4x512xf32>
    %cst_46 = arith.constant 0.000000e+00 : f32
    %74 = vector.broadcast %cst_46 : f32 to vector<4x17xf32>
    %c0_47 = arith.constant 0 : index
    %c111_48 = arith.constant 111 : index
    %75 = vector.load %arg10[%c0_47, %c111_48] : memref<4x657xf32, #tpu.memory_space<vmem>>, vector<4x17xf32>
    tpu.vector_store %arg10[%c0_47, %c111_48], %74 {strides = array<i32>} : memref<4x657xf32, #tpu.memory_space<vmem>>, vector<4x17xf32>,
    %cst_49 = arith.constant 0.000000e+00 : f32
    %76 = vector.broadcast %cst_49 : f32 to vector<4x17xf32>
    %c0_50 = arith.constant 0 : index
    %c640_51 = arith.constant 640 : index
    %77 = vector.load %arg10[%c0_50, %c640_51] : memref<4x657xf32, #tpu.memory_space<vmem>>, vector<4x17xf32>
    tpu.vector_store %arg10[%c0_50, %c640_51], %76 {strides = array<i32>} : memref<4x657xf32, #tpu.memory_space<vmem>>, vector<4x17xf32>,
    %c0_52 = arith.constant 0 : index
    %c128_53 = arith.constant 128 : index
    %78 = vector.load %arg10[%c0_52, %c128_53] : memref<4x657xf32, #tpu.memory_space<vmem>>, vector<4x512xf32>
    tpu.vector_store %arg10[%c0_52, %c128_53], %73 {strides = array<i32>} : memref<4x657xf32, #tpu.memory_space<vmem>>, vector<4x512xf32>,
    %c0_54 = arith.constant 0 : index
    %c111_55 = arith.constant 111 : index
    %79 = vector.load %arg10[%c0_54, %c111_55] : memref<4x657xf32, #tpu.memory_space<vmem>>, vector<4x512xf32>
    %80 = arith.mulf %0, %2 : vector<1x512xf32>
    %81 = vector.broadcast %80 : vector<1x512xf32> to vector<4x512xf32>
    %82 = arith.mulf %79, %81 : vector<4x512xf32>
    %c0_56 = arith.constant 0 : index
    %c0_57 = arith.constant 0 : index
    %83 = vector.load %arg11[%c0_56, %c0_57] : memref<36x512xf32, #tpu.memory_space<vmem>>, vector<4x512xf32>
    tpu.vector_store %arg11[%c0_56, %c0_57], %82 {strides = array<i32>} : memref<36x512xf32, #tpu.memory_space<vmem>>, vector<4x512xf32>,
    %c0_58 = arith.constant 0 : index
    %c112_59 = arith.constant 112 : index
    %84 = vector.load %arg10[%c0_58, %c112_59] : memref<4x657xf32, #tpu.memory_space<vmem>>, vector<4x512xf32>
    %85 = vector.broadcast %0 : vector<1x512xf32> to vector<4x512xf32>
    %86 = arith.mulf %84, %85 : vector<4x512xf32>
    %c4_60 = arith.constant 4 : index
    %c0_61 = arith.constant 0 : index
    %87 = vector.load %arg11[%c4_60, %c0_61] : memref<36x512xf32, #tpu.memory_space<vmem>>, vector<4x512xf32>
    tpu.vector_store %arg11[%c4_60, %c0_61], %86 {strides = array<i32>} : memref<36x512xf32, #tpu.memory_space<vmem>>, vector<4x512xf32>,
    %c0_62 = arith.constant 0 : index
    %c113_63 = arith.constant 113 : index
    %88 = vector.load %arg10[%c0_62, %c113_63] : memref<4x657xf32, #tpu.memory_space<vmem>>, vector<4x512xf32>
    %89 = arith.mulf %0, %3 : vector<1x512xf32>
    %90 = vector.broadcast %89 : vector<1x512xf32> to vector<4x512xf32>
    %91 = arith.mulf %88, %90 : vector<4x512xf32>
    %c8_64 = arith.constant 8 : index
    %c0_65 = arith.constant 0 : index
    %92 = vector.load %arg11[%c8_64, %c0_65] : memref<36x512xf32, #tpu.memory_space<vmem>>, vector<4x512xf32>
    tpu.vector_store %arg11[%c8_64, %c0_65], %91 {strides = array<i32>} : memref<36x512xf32, #tpu.memory_space<vmem>>, vector<4x512xf32>,
    %c0_66 = arith.constant 0 : index
    %c127_67 = arith.constant 127 : index
    %93 = vector.load %arg10[%c0_66, %c127_67] : memref<4x657xf32, #tpu.memory_space<vmem>>, vector<4x512xf32>
    %94 = vector.broadcast %2 : vector<1x512xf32> to vector<4x512xf32>
    %95 = arith.mulf %93, %94 : vector<4x512xf32>
    %c12_68 = arith.constant 12 : index
    %c0_69 = arith.constant 0 : index
    %96 = vector.load %arg11[%c12_68, %c0_69] : memref<36x512xf32, #tpu.memory_space<vmem>>, vector<4x512xf32>
    tpu.vector_store %arg11[%c12_68, %c0_69], %95 {strides = array<i32>} : memref<36x512xf32, #tpu.memory_space<vmem>>, vector<4x512xf32>,
    %c0_70 = arith.constant 0 : index
    %c128_71 = arith.constant 128 : index
    %97 = vector.load %arg10[%c0_70, %c128_71] : memref<4x657xf32, #tpu.memory_space<vmem>>, vector<4x512xf32>
    %c16_72 = arith.constant 16 : index
    %c0_73 = arith.constant 0 : index
    %98 = vector.load %arg11[%c16_72, %c0_73] : memref<36x512xf32, #tpu.memory_space<vmem>>, vector<4x512xf32>
    tpu.vector_store %arg11[%c16_72, %c0_73], %97 {strides = array<i32>} : memref<36x512xf32, #tpu.memory_space<vmem>>, vector<4x512xf32>,
    %c0_74 = arith.constant 0 : index
    %c129_75 = arith.constant 129 : index
    %99 = vector.load %arg10[%c0_74, %c129_75] : memref<4x657xf32, #tpu.memory_space<vmem>>, vector<4x512xf32>
    %100 = vector.broadcast %3 : vector<1x512xf32> to vector<4x512xf32>
    %101 = arith.mulf %99, %100 : vector<4x512xf32>
    %c20_76 = arith.constant 20 : index
    %c0_77 = arith.constant 0 : index
    %102 = vector.load %arg11[%c20_76, %c0_77] : memref<36x512xf32, #tpu.memory_space<vmem>>, vector<4x512xf32>
    tpu.vector_store %arg11[%c20_76, %c0_77], %101 {strides = array<i32>} : memref<36x512xf32, #tpu.memory_space<vmem>>, vector<4x512xf32>,
    %c0_78 = arith.constant 0 : index
    %c143_79 = arith.constant 143 : index
    %103 = vector.load %arg10[%c0_78, %c143_79] : memref<4x657xf32, #tpu.memory_space<vmem>>, vector<4x512xf32>
    %104 = arith.mulf %1, %2 : vector<1x512xf32>
    %105 = vector.broadcast %104 : vector<1x512xf32> to vector<4x512xf32>
    %106 = arith.mulf %103, %105 : vector<4x512xf32>
    %c24_80 = arith.constant 24 : index
    %c0_81 = arith.constant 0 : index
    %107 = vector.load %arg11[%c24_80, %c0_81] : memref<36x512xf32, #tpu.memory_space<vmem>>, vector<4x512xf32>
    tpu.vector_store %arg11[%c24_80, %c0_81], %106 {strides = array<i32>} : memref<36x512xf32, #tpu.memory_space<vmem>>, vector<4x512xf32>,
    %c0_82 = arith.constant 0 : index
    %c144_83 = arith.constant 144 : index
    %108 = vector.load %arg10[%c0_82, %c144_83] : memref<4x657xf32, #tpu.memory_space<vmem>>, vector<4x512xf32>
    %109 = vector.broadcast %1 : vector<1x512xf32> to vector<4x512xf32>
    %110 = arith.mulf %108, %109 : vector<4x512xf32>
    %c28_84 = arith.constant 28 : index
    %c0_85 = arith.constant 0 : index
    %111 = vector.load %arg11[%c28_84, %c0_85] : memref<36x512xf32, #tpu.memory_space<vmem>>, vector<4x512xf32>
    tpu.vector_store %arg11[%c28_84, %c0_85], %110 {strides = array<i32>} : memref<36x512xf32, #tpu.memory_space<vmem>>, vector<4x512xf32>,
    %c0_86 = arith.constant 0 : index
    %c145_87 = arith.constant 145 : index
    %112 = vector.load %arg10[%c0_86, %c145_87] : memref<4x657xf32, #tpu.memory_space<vmem>>, vector<4x512xf32>
    %113 = arith.mulf %1, %3 : vector<1x512xf32>
    %114 = vector.broadcast %113 : vector<1x512xf32> to vector<4x512xf32>
    %115 = arith.mulf %112, %114 : vector<4x512xf32>
    %c32_88 = arith.constant 32 : index
    %c0_89 = arith.constant 0 : index
    %116 = vector.load %arg11[%c32_88, %c0_89] : memref<36x512xf32, #tpu.memory_space<vmem>>, vector<4x512xf32>
    tpu.vector_store %arg11[%c32_88, %c0_89], %115 {strides = array<i32>} : memref<36x512xf32, #tpu.memory_space<vmem>>, vector<4x512xf32>,
    %c0_90 = arith.constant 0 : index
    %c0_91 = arith.constant 0 : index
    %117 = vector.load %arg6[%c0_90, %c0_91] : memref<4x36xf32, #tpu.memory_space<vmem>>, vector<4x36xf32>
    %c0_92 = arith.constant 0 : index
    %c0_93 = arith.constant 0 : index
    %118 = vector.load %arg11[%c0_92, %c0_93] : memref<36x512xf32, #tpu.memory_space<vmem>>, vector<36x512xf32>
    %cst_94 = arith.constant dense<0.000000e+00> : vector<4x512xf32>
    %119 = tpu.matmul %117, %118, %cst_94 {dimension_numbers = #tpu.dot_dimension_numbers<[1], [0], [0], [1], [0, 0, 1, 1], [], []>} : vector<4x36xf32>, vector<36x512xf32>, vector<4x512xf32> -> vector<4x512xf32>
    %c0_95 = arith.constant 0 : index
    %c0_96 = arith.constant 0 : index
    %120 = vector.load %arg7[%c0_95, %c0_96] : memref<4x1xf32, #tpu.memory_space<vmem>>, vector<4x1xf32>
    %c0_97 = arith.constant 0 : index
    %c0_98 = arith.constant 0 : index
    %121 = vector.load %arg8[%c0_97, %c0_98] : memref<4x1xf32, #tpu.memory_space<vmem>>, vector<4x1xf32>
    %cst_99 = arith.constant dense<0.000000e+00> : vector<4xf32>
    %122 = vector.multi_reduction <add>, %119, %cst_99 [1] : vector<4x512xf32> to vector<4xf32>
    %123 = vector.shape_cast %122 : vector<4xf32> to vector<4x1xf32>
    %cst_100 = arith.constant 0.001953125 : f32
    %124 = vector.broadcast %cst_100 : f32 to vector<4x1xf32>
    %125 = arith.mulf %123, %124 : vector<4x1xf32>
    %126 = vector.broadcast %125 : vector<4x1xf32> to vector<4x512xf32>
    %127 = arith.subf %119, %126 : vector<4x512xf32>
    %128 = arith.mulf %127, %127 : vector<4x512xf32>
    %cst_101 = arith.constant dense<0.000000e+00> : vector<4xf32>
    %129 = vector.multi_reduction <add>, %128, %cst_101 [1] : vector<4x512xf32> to vector<4xf32>
    %130 = vector.shape_cast %129 : vector<4xf32> to vector<4x1xf32>
    %cst_102 = arith.constant 0.001953125 : f32
    %131 = vector.broadcast %cst_102 : f32 to vector<4x1xf32>
    %132 = arith.mulf %130, %131 : vector<4x1xf32>
    %cst_103 = arith.constant 9.99999974E-6 : f32
    %133 = vector.broadcast %cst_103 : f32 to vector<4x1xf32>
    %134 = arith.addf %132, %133 : vector<4x1xf32>
    %135 = math.rsqrt %134 : vector<4x1xf32>
    %136 = arith.mulf %135, %120 : vector<4x1xf32>
    %137 = vector.broadcast %136 : vector<4x1xf32> to vector<4x512xf32>
    %138 = arith.mulf %127, %137 : vector<4x512xf32>
    %139 = vector.broadcast %121 : vector<4x1xf32> to vector<4x512xf32>
    %140 = arith.addf %138, %139 : vector<4x512xf32>
    %141 = arith.addf %140, %4 : vector<4x512xf32>
    %cst_104 = arith.constant 0.000000e+00 : f32
    %142 = vector.broadcast %cst_104 : f32 to vector<4x512xf32>
    %143 = arith.maximumf %141, %142 : vector<4x512xf32>
    %c0_105 = arith.constant 0 : index
    %c0_106 = arith.constant 0 : index
    %144 = vector.load %arg9[%c0_105, %c0_106] : memref<4x512xf32, #tpu.memory_space<vmem>>, vector<4x512xf32>
    tpu.vector_store %arg9[%c0_105, %c0_106], %143 {strides = array<i32>} : memref<4x512xf32, #tpu.memory_space<vmem>>, vector<4x512xf32>,
    return
  }
  func.func @transform_0(%arg0: i32) -> (i32, i32) {
    %c0_i32 = arith.constant 0 : i32
    %c0_i32_0 = arith.constant 0 : i32
    %c0_i32_1 = arith.constant 0 : i32
    return %c0_i32, %c0_i32_0 : i32, i32
  }
  func.func @transform_1(%arg0: i32) -> (i32, i32) {
    %c0_i32 = arith.constant 0 : i32
    %c0_i32_0 = arith.constant 0 : i32
    %c0_i32_1 = arith.constant 0 : i32
    return %c0_i32, %c0_i32_0 : i32, i32
  }
  func.func @transform_2(%arg0: i32) -> (i32, i32) {
    %c0_i32 = arith.constant 0 : i32
    %c0_i32_0 = arith.constant 0 : i32
    %c0_i32_1 = arith.constant 0 : i32
    return %c0_i32, %c0_i32_0 : i32, i32
  }
  func.func @transform_3(%arg0: i32) -> (i32, i32) {
    %c0_i32 = arith.constant 0 : i32
    %c0_i32_0 = arith.constant 0 : i32
    %c0_i32_1 = arith.constant 0 : i32
    return %c0_i32, %c0_i32_0 : i32, i32
  }
  func.func @transform_4(%arg0: i32) -> (i32, i32) {
    %c0_i32 = arith.constant 0 : i32
    %c0_i32_0 = arith.constant 0 : i32
    %c0_i32_1 = arith.constant 0 : i32
    return %c0_i32, %c0_i32_0 : i32, i32
  }
  func.func @transform_5(%arg0: i32) -> (i32, i32) {
    %c0_i32 = arith.constant 0 : i32
    %c0_i32_0 = arith.constant 0 : i32
    %c0_i32_1 = arith.constant 0 : i32
    return %c0_i32, %c0_i32_0 : i32, i32
  }
  func.func @transform_6(%arg0: i32) -> (i32, i32) {
    %c0_i32 = arith.constant 0 : i32
    %c0_i32_0 = arith.constant 0 : i32
    %c0_i32_1 = arith.constant 0 : i32
    return %c0_i32, %c0_i32_0 : i32, i32
  }
  func.func @transform_7(%arg0: i32) -> (i32, i32) {
    %c0_i32 = arith.constant 0 : i32
    %c0_i32_0 = arith.constant 0 : i32
    %c0_i32_1 = arith.constant 0 : i32
    return %c0_i32, %c0_i32_0 : i32, i32
  }
  func.func @transform_8(%arg0: i32) -> (i32, i32) {
    %c0_i32 = arith.constant 0 : i32
    %c0_i32_0 = arith.constant 0 : i32
    %c0_i32_1 = arith.constant 0 : i32
    return %c0_i32, %c0_i32_0 : i32, i32
  }
}

</mosaic_0001>

<bundles_post_ra>
// kernel: tpu_custom_call.1
= control target key start
LH: loop header
LB: loop body
LE: loop exit
PB: predicated region body
PF: predicated region fallthrough
CT: control target
= control target key end

     0   :  { %13 = vsyncpa [#allocation5], 0  ;;  %s2149_s0 = inlined_call_operand.vmem [shape: f32[4,512], index: 0, kind: input, shape index: {}]   ;;  %s2150_s1 = inlined_call_operand.hbm [shape: f32[4,512], index: 1, kind: input, shape index: {}]   ;;  %s2151_s2 = inlined_call_operand.vmem [shape: f32[4,36], index: 2, kind: input, shape index: {}]   ;;  %s2152_s3 = inlined_call_operand.vmem [shape: f32[4,1], index: 3, kind: input, shape index: {}]   ;;  %s2153_s4 = inlined_call_operand.vmem [shape: f32[4,1], index: 4, kind: input, shape index: {}]   ;;  %s2154_s5 = inlined_call_operand.vmem [shape: f32[4,36], index: 5, kind: input, shape index: {}]   ;;  %s2155_s6 = inlined_call_operand.vmem [shape: f32[4,1], index: 6, kind: input, shape index: {}]   ;;  %s2156_s7 = inlined_call_operand.vmem [shape: f32[4,1], index: 7, kind: input, shape index: {}]   ;;  %s2157_s8 = inlined_call_operand.hbm [shape: f32[4,512], index: 8, kind: output, shape index: {}]  }
   0x1   :  { %14 = vsyncpa [#allocation6], 0  ;;  %s1504_s27 = smov [#allocation4]   ;;  %s1456_s9 = scalar_lea.hbm %s2150_s1, 256 }
   0x2   :  { %s23_s28 = sshll.u32 %s1504_s27, 4  ;;  %p1457_p0 = scmp.ne.s32.totalorder %s2150_s1, %s1456_s9  ;;  %s24_s28 = int_to_ptr.vmem [resolvable:$true] %s23_s28 }
   0x3   :  { %p1460_p1 = scmp.lt.u32.totalorder %s1456_s9, %s2150_s1 }
   0x5   :  { %p1462_p2 = pnand %p1460_p1, %p1457_p0 }
   0x7   :  { %1465 = shalt.err (!%p1462_p2)
}
   0x8   :  { %s1466_s14 = scalar_lea.vmem %s24_s28, 256  ;;  %p1471_p4 = scmp.lt.s32.totalorder %s24_s28, %s24_s28 }
   0x9   :  { %p1467_p3 = scmp.ne.s32.totalorder %s24_s28, %s1466_s14  ;;  %p1472_p5 = scmp.lt.s32.totalorder %s1466_s14, %s1466_s14 }
   0xb   :  { %p1473_p6 = por %p1472_p5, %p1471_p4 }
   0xd   :  { %p1474_p7 = pnand %p1473_p6, %p1467_p3 }
   0xf   :  { %1477 = shalt.err (!%p1474_p7)
}
  0x10   :  { %26 = dma.hbm_to_vmem [thread:$0]  %s2150_s1, 256, %s24_s28, [#allocation5]  }
  0x11   :  { %1500 = dma.done.wait [#allocation5], 256  }
  0x12   :  { %1501 = vsyncadd [#allocation5], 4294967040  ;;  %v62_v0 = vlaneseq  ;;  %vm51_vm0 = vcmask 1044344   ;;  %v1505_v1 = vmov 0.0   ;;  %v1596_v18 = vld [vmem:[%s2149_s0] sm:$0xff]  ;;  %v1601_v19 = vld [vmem:[%s2149_s0 + $0x8] sm:$0xff] }
  0x13   :  { %52 = vst.msk [vmem:[#allocation2] sm:$0xf] %vm51_vm0, %v1505_v1  ;;  %699 = vmatprep.mubr.f32.mxu0 %v1505_v1  ;;  %770 = vmatprep.mubr.f32.mxu1 %v1505_v1  ;;  %v42_v7 = vld [vmem:[#allocation4] ss:$4 sm:$0xf]  ;;  %55 = vst [vmem:[#allocation2 + $0x4] sm:$0xff] %v1596_v18 }
  0x14   :  { %v63_v2 = vshrl.u32 %v62_v0, 7  ;;  %v46_v8 = vld [vmem:[#allocation4 + $0x2] ss:$4 sm:$0xf]  ;;  %56 = vst [vmem:[#allocation2 + $0xc] sm:$0xff] %v1601_v19  ;;  %s1506_s20 = smov 112  }
  0x15   :  { %v48_v13 = vld [vmem:[#allocation4 + $0x3] ss:$4 sm:$0xf]  ;;  %v60_v22 = vmul.f32 %v46_v8, %v42_v7  ;;  %334 = vst [vmem:[#allocation3 + $0x40] sm:$0xf] %v1596_v18  ;;  %s1507_s21 = smov 127  }
  0x16   :  { %v1577_v3 = vsub.s32 0, %v63_v2  ;;  %v1579_v4 = vsub.s32 1, %v63_v2  ;;  %v1581_v5 = vsub.s32 2, %v63_v2  ;;  %v1583_v6 = vsub.s32 3, %v63_v2  ;;  %336 = vst [vmem:[#allocation3 + $0x50] sm:$0xf] %v1601_v19 }
  0x17   :  { %v195_v23 = vmul.f32 %v48_v13, %v42_v7  ;;  %s1508_s0 = smov 111   ;;  %s1509_s22 = smov 113   ;;  %v44_v43 = vld [vmem:[#allocation4 + $0x1] ss:$4 sm:$0xf]  ;;  %vm53_vm1 = vcmask 134144  }
  0x18   :  { %v132_v9 = vrot.slane %v42_v7, %v1577_v3  ;;  %v136_v10 = vrot.slane %v42_v7, %v1579_v4  ;;  %v266_v11 = vrot.slane %v46_v8, %v1577_v3  ;;  %v270_v12 = vrot.slane %v46_v8, %v1579_v4  ;;  %54 = vst.msk [vmem:[#allocation2 + $0x14] sm:$0xf] %vm53_vm1, %v1505_v1  ;;  %s1510_s23 = smov 1   ;;  %s1511_s24 = smov 16  }
  0x19   :  { %v140_v14 = vrot.slane %v42_v7, %v1581_v5  ;;  %v144_v15 = vrot.slane %v42_v7, %v1583_v6  ;;  %v274_v16 = vrot.slane %v46_v8, %v1581_v5  ;;  %v278_v17 = vrot.slane %v46_v8, %v1583_v6  ;;  %s1512_s25 = smov 15   ;;  %s1513_s26 = smov 17  }
  0x1a   :  { %v145_v20 = vcombine.low %v132_v9, %v136_v10  ;;  %v279_v21 = vcombine.low %v266_v11, %v270_v12  ;;  %v65_v26 = vrot.slane %v60_v22, %v1577_v3  ;;  %v69_v27 = vrot.slane %v60_v22, %v1579_v4  ;;  %v1619_v36 = vld [vmem:[#allocation2] sm:$0xff] }
  0x1b   :  { %v146_v24 = vcombine.low %v140_v14, %v144_v15  ;;  %v280_v25 = vcombine.low %v274_v16, %v278_v17  ;;  %v200_v28 = vrot.slane %v195_v23, %v1577_v3  ;;  %v204_v29 = vrot.slane %v195_v23, %v1579_v4  ;;  %832 = vst.msk [vmem:[#allocation2] sm:$0xf] %vm51_vm0, %v1505_v1 }
  0x1c   :  { %147 = vrot.lane.b32.xlu0 %v145_v20, %s1506_s20  ;;  %281 = vrot.lane.b32.xlu1 %v279_v21, %s1507_s21  ;;  %v73_v30 = vrot.slane %v60_v22, %v1581_v5  ;;  %v77_v31 = vrot.slane %v60_v22, %v1583_v6  ;;  %v208_v32 = vrot.slane %v195_v23, %v1581_v5  ;;  %vm153_vm2 = vcmask 916480  }
  0x1d   :  { %v78_v33 = vcombine.low %v65_v26, %v69_v27  ;;  %v213_v34 = vcombine.low %v200_v28, %v204_v29  ;;  %v212_v35 = vrot.slane %v195_v23, %v1583_v6  ;;  %v345_v37 = vrot.slane %v48_v13, %v1577_v3 }
  0x1e   :  { %v349_v38 = vrot.slane %v48_v13, %v1579_v4  ;;  %v353_v39 = vrot.slane %v48_v13, %v1581_v5  ;;  %v79_v40 = vcombine.low %v73_v30, %v77_v31  ;;  %v357_v42 = vrot.slane %v48_v13, %v1583_v6 }
  0x1f   :  { %v214_v41 = vcombine.low %v208_v32, %v212_v35  ;;  %v475_v45 = vrot.slane %v44_v43, %v1577_v3  ;;  %v479_v46 = vrot.slane %v44_v43, %v1579_v4  ;;  %v406_v47 = vmul.f32 %v46_v8, %v44_v43  ;;  %v1643_v58 = vld [vmem:[#allocation2 + $0x14] sm:$0xf]  ;;  %v194_v32 = vld [vmem:[#allocation2 + $0x10] sm:$0xf] }
  0x20   :  { %149 = vrot.lane.b32.xlu0 %v146_v24, %s1506_s20  ;;  %283 = vrot.lane.b32.xlu1 %v280_v25, %s1507_s21  ;;  %v358_v44 = vcombine.low %v345_v37, %v349_v38  ;;  %v359_v48 = vcombine.low %v353_v39, %v357_v42  ;;  %v483_v49 = vrot.slane %v44_v43, %v1581_v5  ;;  %v1645_v59 = vld [vmem:[#allocation2 + $0x14] sm:$0xf]  ;;  %vm287_vm3 = vcmask 1039360   ;;  %v59_v24 = vld [vmem:[#allocation2 + $0x10] sm:$0xf] }
  0x21   :  { %v487_v50 = vrot.slane %v44_v43, %v1583_v6  ;;  %v488_v51 = vcombine.low %v475_v45, %v479_v46  ;;  %v419_v52 = vrot.slane %v406_v47, %v1581_v5  ;;  %v423_v53 = vrot.slane %v406_v47, %v1583_v6  ;;  %v1647_v60 = vld [vmem:[#allocation2 + $0x14] sm:$0xf]  ;;  %v127_v25 = vld [vmem:[#allocation2 + $0x10] sm:$0xf] }
  0x22   :  { %v536_v54 = vmul.f32 %v48_v13, %v44_v43  ;;  %v411_v56 = vrot.slane %v406_v47, %v1577_v3  ;;  %v415_v57 = vrot.slane %v406_v47, %v1579_v4  ;;  %v1649_v61 = vld [vmem:[#allocation2 + $0x14] sm:$0xf]  ;;  %vm313_vm4 = vcmask 7168   ;;  %v261_v39 = vld [vmem:[#allocation2 + $0x10] sm:$0xf] }
  0x23   :  { %v489_v55 = vcombine.low %v483_v49, %v487_v50  ;;  %833 = vst.msk [vmem:[#allocation2 + $0x14] sm:$0xf] %vm53_vm1, %v1505_v1  ;;  %v425_v62 = vcombine.low %v419_v52, %v423_v53  ;;  %vm88_vm5 = vcmask 1043456   ;;  %vm179_vm6 = vcmask 130048   ;;  %v1729_v50 = vld [vmem:[#allocation2 + $0x8] sm:$0xff] }
  0x24   :  { %80 = vrot.lane.b32.xlu0 %v78_v33, %s1508_s0  ;;  %215 = vrot.lane.b32.xlu1 %v213_v34, %s1509_s22  ;;  %v541_v63 = vrot.slane %v536_v54, %v1577_v3  ;;  %v545_v0 = vrot.slane %v536_v54, %v1579_v4  ;;  %v424_v2 = vcombine.low %v411_v56, %v415_v57  ;;  %vm86_vm7 = vcmask 908288  }
  0x25   :  { %v549_v7 = vrot.slane %v536_v54, %v1581_v5  ;;  %v553_v8 = vrot.slane %v536_v54, %v1583_v6  ;;  %v1727_v49 = vcombine.high %v1601_v19, %v1601_v19  ;;  %vm221_vm8 = vcmask 924672  }
  0x26   :  { %v554_v9 = vcombine.low %v541_v63, %v545_v0  ;;  %vm246_vm9 = vcmask 121856   ;;  %vm112_vm10 = vcmask 138240   ;;  %vm619_vm11 = vcmask 293888  }
  0x27   :  { %v555_v10 = vcombine.low %v549_v7, %v553_v8  ;;  %337 = vst [vmem:[#allocation3 + $0x58] sm:$0xf] %v1727_v49 }
  0x28   :  { %82 = vrot.lane.b32.xlu0 %v79_v40, %s1508_s0  ;;  %217 = vrot.lane.b32.xlu1 %v214_v41, %s1509_s22 }
  0x2c   :  { %360 = vrot.lane.b32.xlu0 %v358_v44, %s1510_s23  ;;  %362 = vrot.lane.b32.xlu1 %v359_v48, %s1510_s23 }
  0x30   :  { %490 = vrot.lane.b32.xlu0 %v488_v51, %s1511_s24  ;;  %492 = vrot.lane.b32.xlu1 %v489_v55, %s1511_s24 }
  0x34   :  { %428 = vrot.lane.b32.xlu1 %v425_v62, %s1512_s25  ;;  %426 = vrot.lane.b32.xlu0 %v424_v2, %s1512_s25 }
  0x38   :  { %556 = vrot.lane.b32.xlu0 %v554_v9, %s1513_s26  ;;  %558 = vrot.lane.b32.xlu1 %v555_v10, %s1513_s26 }
  0x8e   :  { %v148_v3 = vpop.permute.xlu0 %147  ;;  %v282_v4 = vpop.permute.xlu1 %281 }
  0x8f   :  { %v151_v11 = vrot.slane %v148_v3, 4  ;;  %v285_v5 = vrot.slane %v282_v4, 4 }
  0x91   :  { %v1664_v6 = vsel %vm153_vm2, %v151_v11, %v148_v3  ;;  %v1667_v12 = vsel %vm287_vm3, %v285_v5, %v282_v4 }
  0x92   :  { %v1671_v13 = vmul.f32 %v1664_v6, %v1619_v36  ;;  %v150_v14 = vpop.permute.xlu0 %149  ;;  %v284_v15 = vpop.permute.xlu1 %283  ;;  %v1677_v16 = vmul.f32 %v1667_v12, %v1619_v36 }
  0x93   :  { %v1685_v21 = vrot.slane %v150_v14, 4  ;;  %v1707_v40 = vrot.slane %v284_v15, 4 }
  0x94   :  { %171 = vrot.lane.b32.xlu0 %v1671_v13, %s1511_s24 }
  0x95   :  { %v162_v28 = vmul.f32 %v1685_v21, %v127_v25  ;;  %v155_v44 = vsel %vm88_vm5, %v151_v11, %v1685_v21  ;;  %v296_v47 = vmul.f32 %v1707_v40, %v261_v39  ;;  %v289_v54 = vsel %vm88_vm5, %v285_v5, %v1707_v40 }
  0x96   :  { %v1679_v17 = vpop.permute.xlu0 %80  ;;  %v1681_v20 = vpop.permute.xlu1 %215  ;;  %v1732_v51 = vsel %vm153_vm2, %v155_v44, %v150_v14  ;;  %v1750_v62 = vsel %vm287_vm3, %v289_v54, %v284_v15  ;;  %v166_v14 = vcombine.low %v1671_v13, %v1671_v13 }
  0x97   :  { %v168_v35 = vcombine.low %v162_v28, %v162_v28  ;;  %v302_v55 = vcombine.low %v296_v47, %v296_v47  ;;  %v161_v56 = vmul.f32 %v1732_v51, %v1729_v50  ;;  %v295_v8 = vmul.f32 %v1750_v62, %v1729_v50 }
  0x98   :  { %305 = vrot.lane.b32.xlu0 %v1677_v16, %s1510_s23  ;;  %v84_v11 = vrot.slane %v1679_v17, 4 }
  0x9a   :  { %v1687_v22 = vpop.permute.xlu0 %82  ;;  %v1689_v23 = vpop.permute.xlu1 %217  ;;  %v1786_v15 = vsel %vm86_vm7, %v84_v11, %v1679_v17 }
  0x9b   :  { %v1692_v26 = vrot.slane %v1687_v22, 4  ;;  %v1698_v33 = vrot.slane %v1689_v23, 4 }
  0x9d   :  { %v96_v27 = vmul.f32 %v1692_v26, %v59_v24  ;;  %v230_v43 = vmul.f32 %v1698_v33, %v194_v32  ;;  %v219_v24 = vrot.slane %v1681_v20, 4  ;;  %v89_v28 = vsel %vm88_vm5, %v84_v11, %v1692_v26 }
  0x9e   :  { %v361_v29 = vpop.permute.xlu0 %360  ;;  %v363_v30 = vpop.permute.xlu1 %362 }
  0x9f   :  { %v364_v31 = vrot.slane %v361_v29, 4  ;;  %110 = vrot.lane.b32.xlu1 %v96_v27, %s1513_s26  ;;  %v1709_v41 = vrot.slane %v363_v30, 4  ;;  %v94_v27 = vmul.f32 %v1619_v36, %v1786_v15  ;;  %v1800_v17 = vsel %vm221_vm8, %v219_v24, %v1681_v20 }
  0xa0   :  { %v223_v32 = vsel %vm88_vm5, %v219_v24, %v1698_v33 }
  0xa1   :  { %v1701_v34 = vsel %vm313_vm4, %v364_v31, %v361_v29  ;;  %v367_v52 = vsel %vm88_vm5, %v364_v31, %v1709_v41  ;;  %v374_v9 = vmul.f32 %v1709_v41, %v1643_v58  ;;  %v1810_v29 = vsel %vm86_vm7, %v89_v28, %v1687_v22 }
  0xa2   :  { %v1705_v37 = vmul.f32 %v1701_v34, %v1596_v18  ;;  %v491_v38 = vpop.permute.xlu0 %490  ;;  %v493_v45 = vpop.permute.xlu1 %492  ;;  %v1747_v57 = vsel %vm313_vm4, %v367_v52, %v363_v30  ;;  %v228_v30 = vmul.f32 %v1800_v17, %v1619_v36  ;;  %v95_v20 = vmul.f32 %v1729_v50, %v1810_v29 }
  0xa3   :  { %v494_v42 = vrot.slane %v491_v38, 4  ;;  %177 = vrot.lane.b32.xlu1 %v168_v35, %s1511_s24  ;;  %v1736_v53 = vrot.slane %v493_v45, 4  ;;  %v1758_v0 = vmul.f32 %v1747_v57, %v1601_v19  ;;  %v380_v4 = vcombine.low %v374_v9, %v374_v9 }
  0xa4   :  { %383 = vrot.lane.b32.xlu0 %v1705_v37, %s1507_s21  ;;  %v378_v31 = vcombine.low %v1705_v37, %v1705_v37  ;;  %v167_v22 = vcombine.low %v161_v56, %v161_v56  ;;  %v1826_v36 = vcombine.high %v1596_v18, %v1596_v18  ;;  %v1830_v35 = vsel %vm221_vm8, %v223_v32, %v1689_v23 }
  0xa5   :  { %v1718_v46 = vsel %vm179_vm6, %v494_v42, %v491_v38  ;;  %v497_v63 = vsel %vm88_vm5, %v494_v42, %v1736_v53  ;;  %v229_v37 = vmul.f32 %v1830_v35, %v1729_v50  ;;  %v100_v39 = vcombine.high %v94_v27, %v94_v27 }
  0xa6   :  { %v1723_v48 = vmul.f32 %v1718_v46, %v1596_v18  ;;  %v429_v2 = vpop.permute.xlu1 %428  ;;  %v1761_v7 = vsel %vm179_vm6, %v497_v63, %v493_v45  ;;  %v427_v5 = vpop.permute.xlu0 %426  ;;  %335 = vst [vmem:[#allocation3 + $0x48] sm:$0xf] %v1826_v36  ;;  %v301_v42 = vcombine.low %v295_v8, %v295_v8  ;;  %v234_v23 = vcombine.high %v228_v30, %v228_v30 }
  0xa7   :  { %244 = vrot.lane.b32.xlu1 %v230_v43, %s1512_s25  ;;  %v1770_v10 = vrot.slane %v429_v2, 4  ;;  %v1774_v3 = vmul.f32 %v1761_v7, %v1601_v19  ;;  %v430_v25 = vrot.slane %v427_v5, 4  ;;  %v379_v45 = vcombine.low %v1758_v0, %v1758_v0 }
  0xa8   :  { %513 = vrot.lane.b32.xlu0 %v1723_v48, %s1506_s20  ;;  %v508_v38 = vcombine.low %v1723_v48, %v1723_v48  ;;  %v504_v9 = vmul.f32 %v1736_v53, %v1647_v60 }
  0xa9   :  { %v440_v58 = vmul.f32 %v1770_v10, %v1645_v59  ;;  %v300_v59 = vcombine.low %v1677_v16, %v1677_v16  ;;  %v1796_v13 = vsel %vm246_vm9, %v430_v25, %v427_v5  ;;  %v433_v43 = vsel %vm88_vm5, %v430_v25, %v1770_v10 }
  0xaa   :  { %v438_v16 = vmul.f32 %v1796_v13, %v1596_v18  ;;  %v557_v44 = vpop.permute.xlu0 %556  ;;  %v1848_v50 = vsel %vm246_vm9, %v433_v43, %v429_v2  ;;  %v559_v52 = vpop.permute.xlu1 %558  ;;  %v509_v2 = vcombine.low %v1774_v3, %v1774_v3 }
  0xab   :  { %311 = vrot.lane.b32.xlu1 %v302_v55, %s1510_s23  ;;  %v560_v48 = vrot.slane %v557_v44, 4  ;;  %v439_v54 = vmul.f32 %v1848_v50, %v1601_v19  ;;  %v1858_v63 = vrot.slane %v559_v52, 4 }
  0xac   :  { %175 = vrot.lane.b32.xlu0 %v161_v56, %s1511_s24  ;;  %v444_v47 = vcombine.high %v438_v16, %v438_v16  ;;  %v101_v56 = vcombine.high %v95_v20, %v95_v20 }
  0xad   :  { %v1855_v55 = vsel %vm112_vm10, %v560_v48, %v557_v44  ;;  %v570_v24 = vmul.f32 %v1858_v63, %v1649_v61 }
  0xaf   :  { %387 = vrot.lane.b32.xlu1 %v1758_v0, %s1507_s21  ;;  %v568_v0 = vmul.f32 %v1855_v55, %v1596_v18 }
  0xb0   :  { %309 = vrot.lane.b32.xlu0 %v295_v8, %s1510_s23  ;;  %v235_v8 = vcombine.high %v229_v37, %v229_v37 }
  0xb1   :  { %v574_v11 = vcombine.high %v568_v0, %v568_v0 }
  0xb3   :  { %517 = vrot.lane.b32.xlu1 %v1774_v3, %s1506_s20  ;;  %v445_v3 = vcombine.high %v439_v54, %v439_v54 }
  0xb4   :  { %389 = vrot.lane.b32.xlu0 %v380_v4, %s1507_s21  ;;  %v563_v4 = vsel %vm88_vm5, %v560_v48, %v1858_v63 }
  0xb5   :  { %v1872_v5 = vsel %vm112_vm10, %v563_v4, %v559_v52 }
  0xb6   :  { %v569_v60 = vmul.f32 %v1872_v5, %v1601_v19 }
  0xb7   :  { %169 = vrot.lane.b32.xlu1 %v166_v14, %s1511_s24 }
  0xb8   :  { %454 = vrot.lane.b32.xlu0 %v440_v58, %s1509_s22  ;;  %v510_v58 = vcombine.low %v504_v9, %v504_v9  ;;  %v575_v14 = vcombine.high %v569_v60, %v569_v60 }
  0xbb   :  { %303 = vrot.lane.b32.xlu1 %v300_v59, %s1510_s23 }
  0xbc   :  { %102 = vrot.lane.b32.xlu0 %v94_v27, %s1513_s26 }
  0xbf   :  { %446 = vrot.lane.b32.xlu1 %v438_v16, %s1509_s22 }
  0xc0   :  { %236 = vrot.lane.b32.xlu0 %v228_v30, %s1512_s25 }
  0xc3   :  { %106 = vrot.lane.b32.xlu1 %v95_v20, %s1513_s26 }
  0xc4   :  { %381 = vrot.lane.b32.xlu0 %v378_v31, %s1507_s21 }
  0xc7   :  { %173 = vrot.lane.b32.xlu1 %v167_v22, %s1511_s24 }
  0xc8   :  { %511 = vrot.lane.b32.xlu0 %v508_v38, %s1506_s20 }
  0xcb   :  { %240 = vrot.lane.b32.xlu1 %v229_v37, %s1512_s25 }
  0xcc   :  { %104 = vrot.lane.b32.xlu0 %v100_v39, %s1513_s26 }
  0xcf   :  { %307 = vrot.lane.b32.xlu1 %v301_v42, %s1510_s23 }
  0xd0   :  { %238 = vrot.lane.b32.xlu0 %v234_v23, %s1512_s25 }
  0xd3   :  { %385 = vrot.lane.b32.xlu1 %v379_v45, %s1507_s21 }
  0xd4   :  { %448 = vrot.lane.b32.xlu0 %v444_v47, %s1509_s22 }
  0xd7   :  { %450 = vrot.lane.b32.xlu1 %v439_v54, %s1509_s22 }
  0xd8   :  { %108 = vrot.lane.b32.xlu0 %v101_v56, %s1513_s26 }
  0xdb   :  { %515 = vrot.lane.b32.xlu1 %v509_v2, %s1506_s20 }
  0xdc   :  { %242 = vrot.lane.b32.xlu0 %v235_v8, %s1512_s25 }
  0xdf   :  { %578 = vrot.lane.b32.xlu1 %v574_v11, %s1508_s0 }
  0xe0   :  { %519 = vrot.lane.b32.xlu0 %v510_v58, %s1506_s20 }
  0xe3   :  { %452 = vrot.lane.b32.xlu1 %v445_v3, %s1509_s22 }
  0xe4   :  { %580 = vrot.lane.b32.xlu0 %v569_v60, %s1508_s0 }
  0xe7   :  { %576 = vrot.lane.b32.xlu1 %v568_v0, %s1508_s0 }
  0xe8   :  { %582 = vrot.lane.b32.xlu0 %v575_v14, %s1508_s0 }
  0xeb   :  { %584 = vrot.lane.b32.xlu1 %v570_v24, %s1508_s0 }
 0x106   :  { %v172_v25 = vpop.permute.xlu0 %171 }
 0x10a   :  { %v306_v27 = vpop.permute.xlu0 %305 }
 0x111   :  { %v1885_v59 = vpop.permute.xlu1 %110 }
 0x115   :  { %v178_v28 = vpop.permute.xlu1 %177 }
 0x116   :  { %v384_v16 = vpop.permute.xlu0 %383 }
 0x119   :  { %v1887_v30 = vpop.permute.xlu1 %244 }
 0x11a   :  { %v1889_v20 = vpop.permute.xlu0 %513 }
 0x11d   :  { %v312_v31 = vpop.permute.xlu1 %311 }
 0x11e   :  { %v176_v32 = vpop.permute.xlu0 %175 }
 0x11f   :  { %v183_v22 = vsel %vm179_vm6, %v176_v32, %v178_v28 }
 0x120   :  { %191 = vst [vmem:[#allocation3 + $0x18] sm:$0xf0] %v183_v22 }
 0x121   :  { %v388_v38 = vpop.permute.xlu1 %387 }
 0x122   :  { %v310_v37 = vpop.permute.xlu0 %309 }
 0x123   :  { %v317_v61 = vsel %vm313_vm4, %v310_v37, %v312_v31 }
 0x124   :  { %325 = vst [vmem:[#allocation3 + $0x38] sm:$0xf0] %v317_v61 }
 0x125   :  { %v1893_v39 = vpop.permute.xlu1 %517 }
 0x126   :  { %v390_v42 = vpop.permute.xlu0 %389 }
 0x127   :  { %v394_v23 = vsel %vm287_vm3, %v388_v38, %v390_v42 }
 0x128   :  { %402 = vst [vmem:[#allocation3 + $0x58] sm:$0xf0] %v394_v23 }
 0x129   :  { %v170_v43 = vpop.permute.xlu1 %169 }
 0x12a   :  { %v180_v44 = vsel %vm179_vm6, %v170_v43, %v172_v25  ;;  %v1897_v45 = vpop.permute.xlu0 %454 }
 0x12b   :  { %188 = vst [vmem:[#allocation3] sm:$0xf0] %v180_v44 }
 0x12d   :  { %v304_v47 = vpop.permute.xlu1 %303 }
 0x12e   :  { %v314_v48 = vsel %vm313_vm4, %v304_v47, %v306_v27  ;;  %v103_v52 = vpop.permute.xlu0 %102 }
 0x12f   :  { %322 = vst [vmem:[#allocation3 + $0x20] sm:$0xf0] %v314_v48 }
 0x131   :  { %v447_v54 = vpop.permute.xlu1 %446 }
 0x132   :  { %v237_v56 = vpop.permute.xlu0 %236 }
 0x135   :  { %v107_v0 = vpop.permute.xlu1 %106 }
 0x136   :  { %v382_v2 = vpop.permute.xlu0 %381 }
 0x137   :  { %v391_v8 = vsel %vm287_vm3, %v382_v2, %v384_v16 }
 0x138   :  { %399 = vst [vmem:[#allocation3 + $0x40] sm:$0xf0] %v391_v8 }
 0x139   :  { %v174_v9 = vpop.permute.xlu1 %173 }
 0x13a   :  { %v181_v4 = vsel %vm179_vm6, %v172_v25, %v174_v9  ;;  %v182_v11 = vsel %vm179_vm6, %v174_v9, %v176_v32  ;;  %v512_v58 = vpop.permute.xlu0 %511 }
 0x13b   :  { %189 = vst [vmem:[#allocation3 + $0x8] sm:$0xf0] %v181_v4  ;;  %190 = vst [vmem:[#allocation3 + $0x10] sm:$0xf0] %v182_v11  ;;  %v521_v3 = vsel %vm153_vm2, %v512_v58, %v1889_v20 }
 0x13c   :  { %529 = vst [vmem:[#allocation3 + $0x60] sm:$0xf0] %v521_v3 }
 0x13d   :  { %v241_v60 = vpop.permute.xlu1 %240 }
 0x13e   :  { %v105_v14 = vpop.permute.xlu0 %104 }
 0x13f   :  { %v113_v24 = vsel %vm112_vm10, %v103_v52, %v105_v14  ;;  %v114_v28 = vsel %vm112_vm10, %v105_v14, %v107_v0 }
 0x140   :  { %121 = vst [vmem:[#allocation3] sm:$0xf] %v113_v24  ;;  %122 = vst [vmem:[#allocation3 + $0x8] sm:$0xf] %v114_v28 }
 0x141   :  { %v308_v31 = vpop.permute.xlu1 %307 }
 0x142   :  { %v315_v25 = vsel %vm313_vm4, %v306_v27, %v308_v31  ;;  %v316_v32 = vsel %vm313_vm4, %v308_v31, %v310_v37  ;;  %v239_v22 = vpop.permute.xlu0 %238 }
 0x143   :  { %323 = vst [vmem:[#allocation3 + $0x28] sm:$0xf0] %v315_v25  ;;  %324 = vst [vmem:[#allocation3 + $0x30] sm:$0xf0] %v316_v32  ;;  %v247_v61 = vsel %vm246_vm9, %v237_v56, %v239_v22  ;;  %v248_v42 = vsel %vm246_vm9, %v239_v22, %v241_v60  ;;  %v607_v25 = vld [vmem:[#allocation3 + $0x40] sm:$0xff] }
 0x144   :  { %255 = vst [vmem:[#allocation3 + $0x20] sm:$0xf] %v247_v61  ;;  %256 = vst [vmem:[#allocation3 + $0x28] sm:$0xf] %v248_v42 }
 0x145   :  { %v386_v23 = vpop.permute.xlu1 %385 }
 0x146   :  { %v392_v43 = vsel %vm287_vm3, %v384_v16, %v386_v23  ;;  %v393_v44 = vsel %vm287_vm3, %v386_v23, %v388_v38  ;;  %v449_v47 = vpop.permute.xlu0 %448 }
 0x147   :  { %400 = vst [vmem:[#allocation3 + $0x48] sm:$0xf0] %v392_v43  ;;  %401 = vst [vmem:[#allocation3 + $0x50] sm:$0xf0] %v393_v44  ;;  %v456_v27 = vsel %vm221_vm8, %v447_v54, %v449_v47  ;;  %v600_v56 = vld [vmem:[#allocation3 + $0x8] sm:$0xff]  ;;  %v599_v9 = vld [vmem:[#allocation3] sm:$0xff] }
 0x148   :  { %464 = vst [vmem:[#allocation3 + $0x60] sm:$0xf] %v456_v27 }
 0x149   :  { %v451_v37 = vpop.permute.xlu1 %450 }
 0x14a   :  { %v457_v48 = vsel %vm221_vm8, %v449_v47, %v451_v37  ;;  %v109_v52 = vpop.permute.xlu0 %108 }
 0x14b   :  { %465 = vst [vmem:[#allocation3 + $0x68] sm:$0xf] %v457_v48  ;;  %v115_v2 = vsel %vm112_vm10, %v107_v0, %v109_v52  ;;  %v116_v8 = vsel %vm112_vm10, %v109_v52, %v1885_v59  ;;  %v604_v16 = vld [vmem:[#allocation3 + $0x28] sm:$0xff]  ;;  %v603_v38 = vld [vmem:[#allocation3 + $0x20] sm:$0xff] }
 0x14c   :  { %123 = vst [vmem:[#allocation3 + $0x10] sm:$0xf] %v115_v2  ;;  %124 = vst [vmem:[#allocation3 + $0x18] sm:$0xf] %v116_v8  ;;  %v1404_v4 = vpack.c.bf16 %v604_v16, %v600_v56  ;;  %v1406_v11 = vpack.c.bf16 %v603_v38, %v599_v9  ;;  %v610_v9 = vld [vmem:[#allocation3 + $0x58] sm:$0xff] }
 0x14d   :  { %v516_v54 = vpop.permute.xlu1 %515 }
 0x14e   :  { %v522_v58 = vsel %vm153_vm2, %v1889_v20, %v516_v54  ;;  %v523_v3 = vsel %vm153_vm2, %v516_v54, %v1893_v39  ;;  %1405 = vmatprep.subr.bf16.mxu0 %v1404_v4  ;;  %v243_v14 = vpop.permute.xlu0 %242  ;;  %v608_v42 = vld [vmem:[#allocation3 + $0x48] sm:$0xff] }
 0x14f   :  { %530 = vst [vmem:[#allocation3 + $0x68] sm:$0xf0] %v522_v58  ;;  %531 = vst [vmem:[#allocation3 + $0x70] sm:$0xf0] %v523_v3  ;;  %v249_v59 = vsel %vm246_vm9, %v241_v60, %v243_v14  ;;  %v250_v0 = vsel %vm246_vm9, %v243_v14, %v1887_v30  ;;  %1407 = vmatpush1.bf16.msra.mxu0 %v1406_v11  ;;  %v611_v32 = vld [vmem:[#allocation3 + $0x60] sm:$0xff]  ;;  %v609_v11 = vld [vmem:[#allocation3 + $0x50] sm:$0xff] }
 0x150   :  { %257 = vst [vmem:[#allocation3 + $0x30] sm:$0xf] %v249_v59  ;;  %258 = vst [vmem:[#allocation3 + $0x38] sm:$0xf] %v250_v0  ;;  %v1410_v48 = vpack.c.bf16 %v611_v32, %v607_v25  ;;  %v598_v59 = vld [vmem:[%s2151_s2] sm:$0xf] }
 0x151   :  { %v579_v24 = vpop.permute.xlu1 %578 }
 0x152   :  { %v520_v28 = vpop.permute.xlu0 %519 }
 0x153   :  { %v524_v20 = vsel %vm153_vm2, %v1893_v39, %v520_v28  ;;  %v602_v23 = vld [vmem:[#allocation3 + $0x18] sm:$0xff]  ;;  %v601_v39 = vld [vmem:[#allocation3 + $0x10] sm:$0xff] }
 0x154   :  { %532 = vst [vmem:[#allocation3 + $0x78] sm:$0xf0] %v524_v20 }
 0x155   :  { %v453_v31 = vpop.permute.xlu1 %452 }
 0x156   :  { %v458_v22 = vsel %vm221_vm8, %v451_v37, %v453_v31  ;;  %v459_v60 = vsel %vm221_vm8, %v453_v31, %v1897_v45  ;;  %v581_v61 = vpop.permute.xlu0 %580  ;;  %v612_v30 = vld [vmem:[#allocation3 + $0x68] sm:$0xff] }
 0x157   :  { %466 = vst [vmem:[#allocation3 + $0x70] sm:$0xf] %v458_v22  ;;  %467 = vst [vmem:[#allocation3 + $0x78] sm:$0xf] %v459_v60  ;;  %v587_v43 = vsel %vm86_vm7, %v579_v24, %v581_v61  ;;  %v1408_v44 = vpack.c.bf16 %v612_v30, %v608_v42  ;;  %v606_v47 = vld [vmem:[#allocation3 + $0x38] sm:$0xff]  ;;  %v605_v27 = vld [vmem:[#allocation3 + $0x30] sm:$0xff] }
 0x158   :  { %595 = vst [vmem:[#allocation3 + $0x88] sm:$0xf] %v587_v43  ;;  %v1412_v52 = vpack.c.bf16 %v606_v47, %v602_v23  ;;  %v1414_v56 = vpack.c.bf16 %v605_v27, %v601_v39 }
 0x159   :  { %v577_v37 = vpop.permute.xlu1 %576  ;;  %1409 = vmatprep.subr.bf16.mxu0 %v1408_v44 }
 0x15a   :  { %v586_v45 = vsel %vm86_vm7, %v577_v37, %v579_v24  ;;  %1411 = vmatpush1.bf16.msra.mxu0 %v1410_v48  ;;  %1413 = vmatprep.subr.bf16.mxu1 %v1412_v52  ;;  %v583_v2 = vpop.permute.xlu0 %582 }
 0x15b   :  { %594 = vst [vmem:[#allocation3 + $0x80] sm:$0xf] %v586_v45  ;;  %v588_v8 = vsel %vm86_vm7, %v581_v61, %v583_v2  ;;  %1415 = vmatpush1.bf16.msra.mxu1 %v1414_v56 }
 0x15c   :  { %596 = vst [vmem:[#allocation3 + $0x90] sm:$0xf] %v588_v8 }
 0x15d   :  { %v585_v16 = vpop.permute.xlu1 %584 }
 0x15e   :  { %v589_v38 = vsel %vm86_vm7, %v583_v2, %v585_v16  ;;  %v614_v4 = vld [vmem:[#allocation3 + $0x78] sm:$0xff]  ;;  %v613_v54 = vld [vmem:[#allocation3 + $0x70] sm:$0xff] }
 0x15f   :  { %597 = vst [vmem:[#allocation3 + $0x98] sm:$0xf] %v589_v38  ;;  %v616_v58 = vld [vmem:[#allocation3 + $0x88] sm:$0xf]  ;;  %v1416_v3 = vpack.c.bf16 %v614_v4, %v610_v9  ;;  %v1418_v14 = vpack.c.bf16 %v613_v54, %v609_v11  ;;  %v1514_v54 = vmov 0  }
 0x160   :  { %1392 = vmatprep.subr.msk.mxu0 %vm88_vm5, %v616_v58  ;;  %1448 = vset.pattern.permute.xlu0 %v1514_v54  ;;  %v778_v58 = vld [vmem:[%s2153_s4] sm:$0xf] }
 0x161   :  { %1417 = vmatprep.subr.bf16.mxu1 %v1416_v3  ;;  %1449 = vset.pattern.permute.xlu1 %v1514_v54 }
 0x162   :  { %1419 = vmatpush1.bf16.msra.mxu1 %v1418_v14  ;;  %v615_v0 = vld [vmem:[#allocation3 + $0x80] sm:$0xf] }
 0x163   :  { %1393 = vmatpush1.msk.msra.mxu0 %vm88_vm5, %v615_v0  ;;  %v617_v28 = vld [vmem:[#allocation3 + $0x90] sm:$0xf]  ;;  %v777_v0 = vld [vmem:[%s2152_s3] sm:$0xf] }
 0x164   :  { %1394 = vmatmul.mubr.msk.f32.vlgmr.msra.gmra.mrb[0].mxu0 %vm619_vm11, %v598_v59 }
 0x165   :  { %1224 = vmatprep.mubr.f32.mxu0 %v1505_v1 }
 0x166   :  { %v618_v24 = vld [vmem:[#allocation3 + $0x98] sm:$0xf] }
 0x167   :  { %1395 = vmatprep.subr.msk.mxu1 %vm88_vm5, %v618_v24  ;;  %v992_v24 = vld [vmem:[#allocation2 + $0x14] sm:$0xf] }
 0x168   :  { %1396 = vmatpush1.msk.msra.mxu1 %vm88_vm5, %v617_v28 }
 0x169   :  { %1397 = vmatmul.mubr.msk.f32.vlgmr.msra.gmra.mrb[0].mxu1 %vm619_vm11, %v598_v59 }
 0x16a   :  { %1295 = vmatprep.mubr.f32.mxu1 %v1505_v1 }
 0x237   :  { %v701_v20 = vpop.f32.mrb[0].mxu0 }
 0x238   :  { %v779_v31 = vsel %vm88_vm5, %v701_v20, 0.0  ;;  %v703_v25 = vpop.f32.mrb[1].mxu0 }
 0x239   :  { %v780_v32 = vsel %vm88_vm5, %v703_v25, 0.0 }
 0x23a   :  { %v781_v22 = vadd.f32 %v780_v32, %v779_v31  ;;  %v995_v31 = vmul.f32 %v992_v24, %v1709_v41  ;;  %v1026_v32 = vld [vmem:[#allocation2 + $0x14] sm:$0xf] }
 0x23c   :  { %v772_v60 = vpop.f32.mrb[0].mxu1 }
 0x23d   :  { %v782_v61 = vsel %vm88_vm5, %v772_v60, 0.0  ;;  %v774_v42 = vpop.f32.mrb[1].mxu1 }
 0x23e   :  { %v783_v30 = vadd.f32 %v782_v61, %v781_v22  ;;  %v784_v23 = vsel %vm88_vm5, %v774_v42, 0.0  ;;  %v1059_v22 = vld [vmem:[#allocation2 + $0x14] sm:$0xf] }
 0x23f   :  { %v1062_v61 = vmul.f32 %v1059_v22, %v1736_v53 }
 0x240   :  { %v785_v43 = vadd.f32 %v784_v23, %v783_v30 }
 0x242   :  { %786 = vadd.xlane.f32.xlu0 %v785_v43 }
 0x2cf   :  { %v787_v44 = vpop.xlane.xlu0 %786 }
 0x2d0   :  { %v788_v47 = vmul.f32 0.001953125, %v787_v44 }
 0x2d2   :  { %v789_v39 = vsub.f32 %v701_v20, %v788_v47  ;;  %v790_v1 = vsub.f32 %v703_v25, %v788_v47  ;;  %v791_v27 = vsub.f32 %v772_v60, %v788_v47  ;;  %v792_v48 = vsub.f32 %v774_v42, %v788_v47 }
 0x2d3   :  { %v1001_v25 = vcombine.low %v995_v31, %v995_v31  ;;  %v1029_v60 = vmul.f32 %v1026_v32, %v1770_v10  ;;  %v1068_v42 = vcombine.low %v1062_v61, %v1062_v61 }
 0x2d4   :  { %v793_v52 = vmul.f32 %v789_v39, %v789_v39  ;;  %v794_v56 = vmul.f32 %v790_v1, %v790_v1  ;;  %v795_v37 = vmul.f32 %v791_v27, %v791_v27  ;;  %v796_v45 = vmul.f32 %v792_v48, %v792_v48 }
 0x2d6   :  { %v797_v2 = vsel %vm88_vm5, %v793_v52, 0.0  ;;  %v798_v8 = vsel %vm88_vm5, %v794_v56, 0.0  ;;  %v800_v9 = vsel %vm88_vm5, %v795_v37, 0.0  ;;  %v802_v4 = vsel %vm88_vm5, %v796_v45, 0.0 }
 0x2d7   :  { %v799_v16 = vadd.f32 %v798_v8, %v797_v2 }
 0x2d9   :  { %v801_v38 = vadd.f32 %v800_v9, %v799_v16 }
 0x2db   :  { %v803_v11 = vadd.f32 %v802_v4, %v801_v38 }
 0x2dd   :  { %804 = vadd.xlane.f32.xlu1 %v803_v11 }
 0x2ee   :  { %821 = vperm.xlu1 %1449, %v778_v58  }
 0x36a   :  { %v805_v3 = vpop.xlane.xlu1 %804 }
 0x36b   :  { %v806_v14 = vmul.f32 0.001953125, %v805_v3 }
 0x36d   :  { %v807_v59 = vadd.f32 1e-05, %v806_v14 }
 0x36e   :  { %v822_v23 = vpop.permute.xlu1 %821 }
 0x36f   :  { %1450 = vrsqrt.f32 %v807_v59 }
 0x379   :  { %v1451_v28 = vpop.eup %1450 }
 0x37a   :  { %v809_v20 = vmul.f32 %v1451_v28, %v777_v0 }
 0x37c   :  { %812 = vperm.xlu0 %1448, %v809_v20  }
 0x380   :  { %1010 = vrot.lane.b32.xlu0 %v1001_v25, %s1507_s21 }
 0x384   :  { %1043 = vrot.lane.b32.xlu0 %v1029_v60, %s1509_s22 }
 0x388   :  { %1077 = vrot.lane.b32.xlu0 %v1068_v42, %s1506_s20 }
 0x3fb   :  { %v813_v30 = vpop.permute.xlu0 %812 }
 0x3fc   :  { %v815_v43 = vmul.f32 %v813_v30, %v789_v39  ;;  %v816_v44 = vmul.f32 %v813_v30, %v790_v1  ;;  %v817_v41 = vmul.f32 %v813_v30, %v791_v27  ;;  %v818_v47 = vmul.f32 %v813_v30, %v792_v48 }
 0x3fe   :  { %v824_v52 = vadd.f32 %v822_v23, %v815_v43  ;;  %v825_v56 = vadd.f32 %v822_v23, %v816_v44  ;;  %v826_v37 = vadd.f32 %v822_v23, %v817_v41  ;;  %v827_v45 = vadd.f32 %v822_v23, %v818_v47  ;;  %v1093_v41 = vld [vmem:[#allocation2 + $0x14] sm:$0xf] }
 0x3ff   :  { %v1096_v47 = vmul.f32 %v1093_v41, %v1858_v63 }
 0x400   :  { %v828_v2 = vmax.f32 %v824_v52, 0.0  ;;  %v829_v8 = vmax.f32 %v825_v56, 0.0  ;;  %v830_v10 = vmax.f32 %v826_v37, 0.0  ;;  %v831_v16 = vmax.f32 %v827_v45, 0.0  ;;  %v1011_v52 = vpop.permute.xlu0 %1010 }
 0x402   :  { %v1965_v53 = vcombine.low %v828_v2, %v829_v8  ;;  %v839_v9 = vcombine.low %v830_v10, %v831_v16  ;;  %v1454_v39 = vcombine.low %v829_v8, %v829_v8  ;;  %v1455_v1 = vcombine.low %v831_v16, %v831_v16 }
 0x404   :  { %842 = vst [vmem:[#allocation2 + $0x4] sm:$0xff] %v1965_v53  ;;  %843 = vst [vmem:[#allocation2 + $0xc] sm:$0xff] %v839_v9  ;;  %v2031_v56 = vpop.permute.xlu0 %1043 }
 0x405   :  { %986 = vst [vmem:[#allocation3 + $0x40] sm:$0xf] %v1965_v53  ;;  %988 = vst [vmem:[#allocation3 + $0x50] sm:$0xf] %v839_v9 }
 0x406   :  { %987 = vst [vmem:[#allocation3 + $0x48] sm:$0xf] %v1454_v39  ;;  %989 = vst [vmem:[#allocation3 + $0x58] sm:$0xf] %v1455_v1 }
 0x408   :  { %v1078_v37 = vpop.permute.xlu0 %1077 }
 0x40b   :  { %v944_v27 = vld [vmem:[#allocation2] sm:$0xff]  ;;  %v845_v48 = vld [vmem:[#allocation2 + $0x8] sm:$0xff]  ;;  %v846_v14 = vld [vmem:[#allocation2 + $0x10] sm:$0xf] }
 0x40c   :  { %v947_v38 = vmul.f32 %v944_v27, %v1667_v12  ;;  %v848_v4 = vmul.f32 %v845_v48, %v1810_v29  ;;  %v880_v11 = vmul.f32 %v944_v27, %v1664_v6  ;;  %v847_v54 = vmul.f32 %v944_v27, %v1786_v15  ;;  %v913_v6 = vld [vmem:[#allocation2 + $0x10] sm:$0xf] }
 0x40d   :  { %v915_v58 = vmul.f32 %v845_v48, %v1830_v35  ;;  %v914_v3 = vmul.f32 %v944_v27, %v1800_v17  ;;  %v849_v12 = vmul.f32 %v846_v14, %v1692_v26  ;;  %v881_v29 = vmul.f32 %v845_v48, %v1732_v51  ;;  %v879_v32 = vld [vmem:[#allocation2 + $0x10] sm:$0xf] }
 0x40e   :  { %958 = vrot.lane.b32.xlu0 %v947_v38, %s1510_s23  ;;  %859 = vrot.lane.b32.xlu1 %v848_v4, %s1513_s26  ;;  %v916_v15 = vmul.f32 %v913_v6, %v1698_v33  ;;  %v948_v35 = vmul.f32 %v845_v48, %v1750_v62  ;;  %v1028_v17 = vmul.f32 %v839_v9, %v1848_v50  ;;  %v946_v61 = vld [vmem:[#allocation2 + $0x10] sm:$0xf] }
 0x40f   :  { %v993_v26 = vmul.f32 %v1965_v53, %v1701_v34  ;;  %v1027_v51 = vmul.f32 %v1965_v53, %v1796_v13  ;;  %v1060_v33 = vmul.f32 %v1965_v53, %v1718_v46  ;;  %v994_v62 = vmul.f32 %v839_v9, %v1747_v57 }
 0x410   :  { %v854_v50 = vcombine.high %v848_v4, %v848_v4  ;;  %v1061_v34 = vmul.f32 %v839_v9, %v1761_v7  ;;  %v921_v59 = vcombine.high %v915_v58, %v915_v58  ;;  %v853_v46 = vcombine.high %v847_v54, %v847_v54 }
 0x411   :  { %v1033_v13 = vcombine.high %v1027_v51, %v1027_v51  ;;  %v999_v0 = vcombine.low %v993_v26, %v993_v26  ;;  %v887_v57 = vcombine.low %v881_v29, %v881_v29  ;;  %v1066_v24 = vcombine.low %v1060_v33, %v1060_v33 }
 0x412   :  { %891 = vrot.lane.b32.xlu1 %v880_v11, %s1511_s24  ;;  %855 = vrot.lane.b32.xlu0 %v847_v54, %s1513_s26  ;;  %v920_v28 = vcombine.high %v914_v3, %v914_v3  ;;  %v1095_v7 = vmul.f32 %v839_v9, %v1872_v5  ;;  %v954_v20 = vcombine.low %v948_v35, %v948_v35 }
 0x413   :  { %v886_v25 = vcombine.low %v880_v11, %v880_v11  ;;  %v953_v22 = vcombine.low %v947_v38, %v947_v38  ;;  %v882_v60 = vmul.f32 %v879_v32, %v1685_v21  ;;  %v949_v5 = vmul.f32 %v946_v61, %v1707_v40 }
 0x414   :  { %v1101_v31 = vcombine.high %v1095_v7, %v1095_v7  ;;  %v1000_v23 = vcombine.low %v994_v62, %v994_v62  ;;  %v1067_v43 = vcombine.low %v1061_v34, %v1061_v34  ;;  %v1094_v21 = vmul.f32 %v1965_v53, %v1855_v55 }
 0x415   :  { %v888_v42 = vcombine.low %v882_v60, %v882_v60  ;;  %v955_v30 = vcombine.low %v949_v5, %v949_v5  ;;  %v1034_v44 = vcombine.high %v1028_v17, %v1028_v17 }
 0x416   :  { %926 = vrot.lane.b32.xlu1 %v915_v58, %s1512_s25  ;;  %922 = vrot.lane.b32.xlu0 %v914_v3, %s1512_s25  ;;  %v1100_v40 = vcombine.high %v1094_v21, %v1094_v21 }
 0x41a   :  { %863 = vrot.lane.b32.xlu1 %v849_v12, %s1513_s26  ;;  %895 = vrot.lane.b32.xlu0 %v881_v29, %s1511_s24 }
 0x41e   :  { %930 = vrot.lane.b32.xlu1 %v916_v15, %s1512_s25  ;;  %962 = vrot.lane.b32.xlu0 %v948_v35, %s1510_s23 }
 0x422   :  { %1039 = vrot.lane.b32.xlu1 %v1028_v17, %s1509_s22  ;;  %1004 = vrot.lane.b32.xlu0 %v993_v26, %s1507_s21 }
 0x426   :  { %1035 = vrot.lane.b32.xlu1 %v1027_v51, %s1509_s22  ;;  %1071 = vrot.lane.b32.xlu0 %v1060_v33, %s1506_s20 }
 0x42a   :  { %1008 = vrot.lane.b32.xlu1 %v994_v62, %s1507_s21  ;;  %861 = vrot.lane.b32.xlu0 %v854_v50, %s1513_s26 }
 0x42e   :  { %1075 = vrot.lane.b32.xlu1 %v1061_v34, %s1506_s20  ;;  %928 = vrot.lane.b32.xlu0 %v921_v59, %s1512_s25 }
 0x432   :  { %1037 = vrot.lane.b32.xlu0 %v1033_v13, %s1509_s22  ;;  %857 = vrot.lane.b32.xlu1 %v853_v46, %s1513_s26 }
 0x436   :  { %1002 = vrot.lane.b32.xlu0 %v999_v0, %s1507_s21  ;;  %893 = vrot.lane.b32.xlu1 %v887_v57, %s1511_s24 }
 0x43a   :  { %1069 = vrot.lane.b32.xlu0 %v1066_v24, %s1506_s20  ;;  %924 = vrot.lane.b32.xlu1 %v920_v28, %s1512_s25 }
 0x43e   :  { %1106 = vrot.lane.b32.xlu0 %v1095_v7, %s1508_s0  ;;  %960 = vrot.lane.b32.xlu1 %v954_v20, %s1510_s23 }
 0x442   :  { %1108 = vrot.lane.b32.xlu0 %v1101_v31, %s1508_s0  ;;  %889 = vrot.lane.b32.xlu1 %v886_v25, %s1511_s24 }
 0x446   :  { %956 = vrot.lane.b32.xlu1 %v953_v22, %s1510_s23 }
 0x44a   :  { %897 = vrot.lane.b32.xlu1 %v888_v42, %s1511_s24 }
 0x44e   :  { %964 = vrot.lane.b32.xlu1 %v955_v30, %s1510_s23 }
 0x452   :  { %1006 = vrot.lane.b32.xlu1 %v1000_v23, %s1507_s21 }
 0x456   :  { %1073 = vrot.lane.b32.xlu1 %v1067_v43, %s1506_s20 }
 0x45a   :  { %1102 = vrot.lane.b32.xlu1 %v1094_v21, %s1508_s0 }
 0x45e   :  { %1041 = vrot.lane.b32.xlu1 %v1034_v44, %s1509_s22 }
 0x462   :  { %1104 = vrot.lane.b32.xlu1 %v1100_v40, %s1508_s0 }
 0x466   :  { %1110 = vrot.lane.b32.xlu1 %v1096_v47, %s1508_s0 }
 0x480   :  { %v2033_v45 = vpop.permute.xlu0 %958  ;;  %v860_v55 = vpop.permute.xlu1 %859 }
 0x484   :  { %v2035_v2 = vpop.permute.xlu1 %891  ;;  %v856_v8 = vpop.permute.xlu0 %855 }
 0x488   :  { %v927_v10 = vpop.permute.xlu1 %926  ;;  %v923_v16 = vpop.permute.xlu0 %922 }
 0x48c   :  { %v864_v53 = vpop.permute.xlu1 %863  ;;  %v2037_v9 = vpop.permute.xlu0 %895 }
 0x490   :  { %v931_v39 = vpop.permute.xlu1 %930  ;;  %v2039_v1 = vpop.permute.xlu0 %962 }
 0x494   :  { %v2041_v63 = vpop.permute.xlu1 %1039  ;;  %v2043_v27 = vpop.permute.xlu0 %1004 }
 0x498   :  { %v1036_v48 = vpop.permute.xlu1 %1035  ;;  %v2045_v38 = vpop.permute.xlu0 %1071 }
 0x49c   :  { %v2047_v4 = vpop.permute.xlu1 %1008  ;;  %v862_v11 = vpop.permute.xlu0 %861 }
 0x49d   :  { %v1015_v54 = vsel %vm287_vm3, %v2047_v4, %v1011_v52  ;;  %v867_v58 = vsel %vm112_vm10, %v860_v55, %v862_v11  ;;  %v868_v3 = vsel %vm112_vm10, %v862_v11, %v864_v53 }
 0x49e   :  { %1023 = vst [vmem:[#allocation3 + $0x58] sm:$0xf0] %v1015_v54  ;;  %875 = vst [vmem:[#allocation3 + $0x10] sm:$0xf] %v867_v58 }
 0x49f   :  { %876 = vst [vmem:[#allocation3 + $0x18] sm:$0xf] %v868_v3 }
 0x4a0   :  { %v2053_v14 = vpop.permute.xlu1 %1075  ;;  %v929_v12 = vpop.permute.xlu0 %928 }
 0x4a1   :  { %v1082_v29 = vsel %vm153_vm2, %v2053_v14, %v1078_v37  ;;  %v934_v6 = vsel %vm246_vm9, %v927_v10, %v929_v12  ;;  %v935_v15 = vsel %vm246_vm9, %v929_v12, %v931_v39 }
 0x4a2   :  { %1090 = vst [vmem:[#allocation3 + $0x78] sm:$0xf0] %v1082_v29  ;;  %942 = vst [vmem:[#allocation3 + $0x30] sm:$0xf] %v934_v6 }
 0x4a3   :  { %943 = vst [vmem:[#allocation3 + $0x38] sm:$0xf] %v935_v15 }
 0x4a4   :  { %v1038_v35 = vpop.permute.xlu0 %1037  ;;  %v858_v17 = vpop.permute.xlu1 %857 }
 0x4a5   :  { %v1045_v26 = vsel %vm221_vm8, %v1036_v48, %v1038_v35  ;;  %v1046_v51 = vsel %vm221_vm8, %v1038_v35, %v2041_v63  ;;  %v865_v33 = vsel %vm112_vm10, %v856_v8, %v858_v17  ;;  %v866_v62 = vsel %vm112_vm10, %v858_v17, %v860_v55 }
 0x4a6   :  { %1053 = vst [vmem:[#allocation3 + $0x60] sm:$0xf] %v1045_v26  ;;  %1054 = vst [vmem:[#allocation3 + $0x68] sm:$0xf] %v1046_v51  ;;  %v1136_v51 = vld [vmem:[#allocation3 + $0x58] sm:$0xff] }
 0x4a7   :  { %873 = vst [vmem:[#allocation3] sm:$0xf] %v865_v33  ;;  %874 = vst [vmem:[#allocation3 + $0x8] sm:$0xf] %v866_v62 }
 0x4a8   :  { %v1003_v50 = vpop.permute.xlu0 %1002  ;;  %v894_v34 = vpop.permute.xlu1 %893 }
 0x4a9   :  { %v1012_v59 = vsel %vm287_vm3, %v1003_v50, %v2043_v27  ;;  %v900_v13 = vsel %vm179_vm6, %v2035_v2, %v894_v34  ;;  %v901_v46 = vsel %vm179_vm6, %v894_v34, %v2037_v9 }
 0x4aa   :  { %1020 = vst [vmem:[#allocation3 + $0x40] sm:$0xf0] %v1012_v59  ;;  %908 = vst [vmem:[#allocation3 + $0x8] sm:$0xf0] %v900_v13 }
 0x4ab   :  { %909 = vst [vmem:[#allocation3 + $0x10] sm:$0xf0] %v901_v46 }
 0x4ac   :  { %v1070_v0 = vpop.permute.xlu0 %1069  ;;  %v925_v57 = vpop.permute.xlu1 %924 }
 0x4ad   :  { %v1079_v24 = vsel %vm153_vm2, %v1070_v0, %v2045_v38  ;;  %v932_v28 = vsel %vm246_vm9, %v923_v16, %v925_v57  ;;  %v933_v7 = vsel %vm246_vm9, %v925_v57, %v927_v10  ;;  %v1124_v0 = vld [vmem:[%s2154_s5] sm:$0xf] }
 0x4ae   :  { %1087 = vst [vmem:[#allocation3 + $0x60] sm:$0xf0] %v1079_v24  ;;  %940 = vst [vmem:[#allocation3 + $0x20] sm:$0xf] %v932_v28 }
 0x4af   :  { %941 = vst [vmem:[#allocation3 + $0x28] sm:$0xf] %v933_v7 }
 0x4b0   :  { %v2074_v20 = vpop.permute.xlu0 %1106  ;;  %v961_v31 = vpop.permute.xlu1 %960 }
 0x4b1   :  { %v967_v25 = vsel %vm313_vm4, %v2033_v45, %v961_v31  ;;  %v968_v32 = vsel %vm313_vm4, %v961_v31, %v2039_v1  ;;  %v1126_v23 = vld [vmem:[#allocation3 + $0x8] sm:$0xff]  ;;  %v1133_v6 = vld [vmem:[#allocation3 + $0x40] sm:$0xff] }
 0x4b2   :  { %975 = vst [vmem:[#allocation3 + $0x28] sm:$0xf0] %v967_v25  ;;  %976 = vst [vmem:[#allocation3 + $0x30] sm:$0xf0] %v968_v32  ;;  %v1127_v11 = vld [vmem:[#allocation3 + $0x10] sm:$0xff] }
 0x4b4   :  { %v2080_v22 = vpop.permute.xlu0 %1108  ;;  %v890_v60 = vpop.permute.xlu1 %889 }
 0x4b5   :  { %v1114_v61 = vsel %vm86_vm7, %v2074_v20, %v2080_v22  ;;  %v899_v42 = vsel %vm179_vm6, %v890_v60, %v2035_v2  ;;  %v1137_v58 = vld [vmem:[#allocation3 + $0x60] sm:$0xff] }
 0x4b6   :  { %1122 = vst [vmem:[#allocation3 + $0x90] sm:$0xf] %v1114_v61  ;;  %907 = vst [vmem:[#allocation3] sm:$0xf0] %v899_v42  ;;  %v1426_v15 = vpack.c.bf16 %v1137_v58, %v1133_v6 }
 0x4b8   :  { %v957_v5 = vpop.permute.xlu1 %956 }
 0x4b9   :  { %v966_v30 = vsel %vm313_vm4, %v957_v5, %v2033_v45  ;;  %v1130_v43 = vld [vmem:[#allocation3 + $0x28] sm:$0xff]  ;;  %v1131_v16 = vld [vmem:[#allocation3 + $0x30] sm:$0xff] }
 0x4ba   :  { %974 = vst [vmem:[#allocation3 + $0x20] sm:$0xf0] %v966_v30  ;;  %v1420_v21 = vpack.c.bf16 %v1130_v43, %v1126_v23 }
 0x4bc   :  { %1421 = vmatprep.subr.bf16.mxu0 %v1420_v21  ;;  %v898_v44 = vpop.permute.xlu1 %897 }
 0x4bd   :  { %v902_v40 = vsel %vm179_vm6, %v2037_v9, %v898_v44  ;;  %v1125_v52 = vld [vmem:[#allocation3] sm:$0xff]  ;;  %v1143_v24 = vld [vmem:[#allocation3 + $0x90] sm:$0xf] }
 0x4be   :  { %910 = vst [vmem:[#allocation3 + $0x18] sm:$0xf0] %v902_v40 }
 0x4c0   :  { %v965_v41 = vpop.permute.xlu1 %964 }
 0x4c1   :  { %v969_v47 = vsel %vm313_vm4, %v2039_v1, %v965_v41  ;;  %v1129_v37 = vld [vmem:[#allocation3 + $0x20] sm:$0xff] }
 0x4c2   :  { %977 = vst [vmem:[#allocation3 + $0x38] sm:$0xf0] %v969_v47  ;;  %v1422_v55 = vpack.c.bf16 %v1129_v37, %v1125_v52 }
 0x4c4   :  { %1423 = vmatpush1.bf16.msra.mxu0 %v1422_v55  ;;  %v1007_v45 = vpop.permute.xlu1 %1006 }
 0x4c5   :  { %v1013_v2 = vsel %vm287_vm3, %v2043_v27, %v1007_v45  ;;  %v1014_v8 = vsel %vm287_vm3, %v1007_v45, %v2047_v4  ;;  %v1128_v39 = vld [vmem:[#allocation3 + $0x18] sm:$0xff]  ;;  %v1430_v27 = vpack.c.bf16 %v1131_v16, %v1127_v11  ;;  %v1302_v11 = vld [vmem:[%s2155_s6] sm:$0xf]  ;;  %s1515_s6 = smov [#allocation7]  }
 0x4c6   :  { %1021 = vst [vmem:[#allocation3 + $0x48] sm:$0xf0] %v1013_v2  ;;  %1022 = vst [vmem:[#allocation3 + $0x50] sm:$0xf0] %v1014_v8 }
 0x4c8   :  { %v1074_v10 = vpop.permute.xlu1 %1073 }
 0x4c9   :  { %v1080_v53 = vsel %vm153_vm2, %v2045_v38, %v1074_v10  ;;  %v1081_v9 = vsel %vm153_vm2, %v1074_v10, %v2053_v14  ;;  %v1132_v1 = vld [vmem:[#allocation3 + $0x38] sm:$0xff] }
 0x4ca   :  { %1088 = vst [vmem:[#allocation3 + $0x68] sm:$0xf0] %v1080_v53  ;;  %1089 = vst [vmem:[#allocation3 + $0x70] sm:$0xf0] %v1081_v9  ;;  %v1428_v48 = vpack.c.bf16 %v1132_v1, %v1128_v39  ;;  %v1303_v9 = vld [vmem:[%s2156_s7] sm:$0xf] }
 0x4cb   :  { %s1383_s7 = sshll.u32 %s1515_s6, 4  ;;  %s1384_s7 = int_to_ptr.vmem [resolvable:$true] %s1383_s7 }
 0x4cc   :  { %1429 = vmatprep.subr.bf16.mxu1 %v1428_v48  ;;  %v1103_v54 = vpop.permute.xlu1 %1102  ;;  %s1478_s13 = scalar_lea.vmem %s1384_s7, 256  ;;  %p1483_p9 = scmp.lt.s32.totalorder %s1384_s7, %s1384_s7 }
 0x4cd   :  { %1431 = vmatpush1.bf16.msra.mxu1 %v1430_v27  ;;  %v1134_v12 = vld [vmem:[#allocation3 + $0x48] sm:$0xff]  ;;  %v1135_v62 = vld [vmem:[#allocation3 + $0x50] sm:$0xff]  ;;  %p1479_p8 = scmp.ne.s32.totalorder %s1384_s7, %s1478_s13  ;;  %p1484_p10 = scmp.lt.s32.totalorder %s1478_s13, %s1478_s13 }
 0x4cf   :  { %p1485_p11 = por %p1484_p10, %p1483_p9 }
 0x4d0   :  { %v1042_v4 = vpop.permute.xlu1 %1041 }
 0x4d1   :  { %v1047_v3 = vsel %vm221_vm8, %v2041_v63, %v1042_v4  ;;  %v1048_v38 = vsel %vm221_vm8, %v1042_v4, %v2031_v56  ;;  %v1138_v14 = vld [vmem:[#allocation3 + $0x68] sm:$0xff]  ;;  %p1486_p12 = pnand %p1485_p11, %p1479_p8 }
 0x4d2   :  { %1055 = vst [vmem:[#allocation3 + $0x70] sm:$0xf] %v1047_v3  ;;  %1056 = vst [vmem:[#allocation3 + $0x78] sm:$0xf] %v1048_v38  ;;  %v1424_v29 = vpack.c.bf16 %v1138_v14, %v1134_v12 }
 0x4d4   :  { %1425 = vmatprep.subr.bf16.mxu0 %v1424_v29  ;;  %v1105_v35 = vpop.permute.xlu1 %1104 }
 0x4d5   :  { %v1112_v17 = vsel %vm86_vm7, %v1103_v54, %v1105_v35  ;;  %v1113_v26 = vsel %vm86_vm7, %v1105_v35, %v2074_v20  ;;  %1427 = vmatpush1.bf16.msra.mxu0 %v1426_v15 }
 0x4d6   :  { %1120 = vst [vmem:[#allocation3 + $0x80] sm:$0xf] %v1112_v17  ;;  %1121 = vst [vmem:[#allocation3 + $0x88] sm:$0xf] %v1113_v26 }
 0x4d8   :  { %v1111_v63 = vpop.permute.xlu1 %1110 }
 0x4d9   :  { %v1115_v56 = vsel %vm86_vm7, %v2080_v22, %v1111_v63  ;;  %v1140_v33 = vld [vmem:[#allocation3 + $0x78] sm:$0xff]  ;;  %v1139_v50 = vld [vmem:[#allocation3 + $0x70] sm:$0xff] }
 0x4da   :  { %1123 = vst [vmem:[#allocation3 + $0x98] sm:$0xf] %v1115_v56  ;;  %v1432_v34 = vpack.c.bf16 %v1140_v33, %v1136_v51  ;;  %v1434_v59 = vpack.c.bf16 %v1139_v50, %v1135_v62 }
 0x4dc   :  { %1433 = vmatprep.subr.bf16.mxu1 %v1432_v34 }
 0x4dd   :  { %1435 = vmatpush1.bf16.msra.mxu1 %v1434_v59  ;;  %v1142_v13 = vld [vmem:[#allocation3 + $0x88] sm:$0xf]  ;;  %v1141_v46 = vld [vmem:[#allocation3 + $0x80] sm:$0xf] }
 0x4de   :  { %1398 = vmatprep.subr.msk.mxu0 %vm88_vm5, %v1142_v13 }
 0x4df   :  { %1399 = vmatpush1.msk.msra.mxu0 %vm88_vm5, %v1141_v46 }
 0x4e0   :  { %1400 = vmatmul.mubr.msk.f32.vlgmr.msra.gmra.mrb[2].mxu0 %vm619_vm11, %v1124_v0 }
 0x4e1   :  { %v1144_v57 = vld [vmem:[#allocation3 + $0x98] sm:$0xf] }
 0x4e2   :  { %1401 = vmatprep.subr.msk.mxu1 %vm88_vm5, %v1144_v57 }
 0x4e3   :  { %1402 = vmatpush1.msk.msra.mxu1 %vm88_vm5, %v1143_v24 }
 0x4e4   :  { %1403 = vmatmul.mubr.msk.f32.vlgmr.msra.gmra.mrb[2].mxu1 %vm619_vm11, %v1124_v0 }
 0x5b3   :  { %v1226_v28 = vpop.f32.mrb[2].mxu0 }
 0x5b4   :  { %v1304_v7 = vsel %vm88_vm5, %v1226_v28, 0.0  ;;  %v1228_v20 = vpop.f32.mrb[3].mxu0 }
 0x5b5   :  { %v1305_v31 = vsel %vm88_vm5, %v1228_v20, 0.0 }
 0x5b6   :  { %v1306_v25 = vadd.f32 %v1305_v31, %v1304_v7 }
 0x5b7   :  { %v1297_v32 = vpop.f32.mrb[2].mxu1 }
 0x5b8   :  { %v1307_v22 = vsel %vm88_vm5, %v1297_v32, 0.0  ;;  %v1299_v60 = vpop.f32.mrb[3].mxu1 }
 0x5b9   :  { %v1308_v61 = vadd.f32 %v1307_v22, %v1306_v25  ;;  %v1309_v42 = vsel %vm88_vm5, %v1299_v60, 0.0 }
 0x5bb   :  { %v1310_v5 = vadd.f32 %v1309_v42, %v1308_v61 }
 0x5bd   :  { %1311 = vadd.xlane.f32.xlu0 %v1310_v5 }
 0x64a   :  { %v1312_v30 = vpop.xlane.xlu0 %1311 }
 0x64b   :  { %v1313_v23 = vmul.f32 0.001953125, %v1312_v30 }
 0x64d   :  { %v1314_v43 = vsub.f32 %v1226_v28, %v1313_v23  ;;  %v1315_v21 = vsub.f32 %v1228_v20, %v1313_v23  ;;  %v1316_v44 = vsub.f32 %v1297_v32, %v1313_v23  ;;  %v1317_v40 = vsub.f32 %v1299_v60, %v1313_v23 }
 0x64f   :  { %v1318_v41 = vmul.f32 %v1314_v43, %v1314_v43  ;;  %v1319_v47 = vmul.f32 %v1315_v21, %v1315_v21  ;;  %v1320_v52 = vmul.f32 %v1316_v44, %v1316_v44  ;;  %v1321_v37 = vmul.f32 %v1317_v40, %v1317_v40 }
 0x651   :  { %v1322_v55 = vsel %vm88_vm5, %v1318_v41, 0.0  ;;  %v1323_v45 = vsel %vm88_vm5, %v1319_v47, 0.0  ;;  %v1325_v8 = vsel %vm88_vm5, %v1320_v52, 0.0  ;;  %v1327_v16 = vsel %vm88_vm5, %v1321_v37, 0.0 }
 0x652   :  { %v1324_v2 = vadd.f32 %v1323_v45, %v1322_v55 }
 0x654   :  { %v1326_v10 = vadd.f32 %v1325_v8, %v1324_v2 }
 0x656   :  { %v1328_v53 = vadd.f32 %v1327_v16, %v1326_v10 }
 0x658   :  { %1329 = vadd.xlane.f32.xlu1 %v1328_v53 }
 0x669   :  { %1346 = vperm.xlu1 %1449, %v1303_v9  }
 0x6e5   :  { %v1330_v39 = vpop.xlane.xlu1 %1329 }
 0x6e6   :  { %v1331_v1 = vmul.f32 0.001953125, %v1330_v39 }
 0x6e8   :  { %v1332_v48 = vadd.f32 1e-05, %v1331_v1 }
 0x6e9   :  { %v1347_v14 = vpop.permute.xlu1 %1346 }
 0x6ea   :  { %1452 = vrsqrt.f32 %v1332_v48 }
 0x6f4   :  { %v1453_v27 = vpop.eup %1452 }
 0x6f5   :  { %v1334_v54 = vmul.f32 %v1453_v27, %v1302_v11 }
 0x6f7   :  { %1337 = vperm.xlu0 %1448, %v1334_v54  }
 0x776   :  { %v1338_v4 = vpop.permute.xlu0 %1337 }
 0x777   :  { %v1340_v58 = vmul.f32 %v1338_v4, %v1314_v43  ;;  %v1341_v3 = vmul.f32 %v1338_v4, %v1315_v21  ;;  %v1342_v38 = vmul.f32 %v1338_v4, %v1316_v44  ;;  %v1343_v12 = vmul.f32 %v1338_v4, %v1317_v40 }
 0x779   :  { %v1349_v29 = vadd.f32 %v1347_v14, %v1340_v58  ;;  %v1350_v6 = vadd.f32 %v1347_v14, %v1341_v3  ;;  %v1351_v15 = vadd.f32 %v1347_v14, %v1342_v38  ;;  %v1352_v35 = vadd.f32 %v1347_v14, %v1343_v12 }
 0x77b   :  { %v1359_v17 = vadd.f32 %v1349_v29, %v1596_v18  ;;  %v1360_v26 = vadd.f32 %v1350_v6, %v1826_v36  ;;  %v1361_v63 = vadd.f32 %v1351_v15, %v1601_v19  ;;  %v1362_v51 = vadd.f32 %v1352_v35, %v1727_v49 }
 0x77d   :  { %v1363_v56 = vmax.f32 %v1359_v17, 0.0  ;;  %v1364_v33 = vmax.f32 %v1360_v26, 0.0  ;;  %v1365_v62 = vmax.f32 %v1361_v63, 0.0  ;;  %v1366_v50 = vmax.f32 %v1362_v51, 0.0 }
 0x77f   :  { %v1371_v34 = vcombine.low %v1363_v56, %v1364_v33  ;;  %v1372_v59 = vcombine.low %v1365_v62, %v1366_v50 }
 0x781   :  { %1375 = vst [vmem:[#allocation7] sm:$0xff] %v1371_v34  ;;  %1376 = vst [vmem:[#allocation7 + $0x8] sm:$0xff] %v1372_v59 }
 0x782   :  { %1489 = shalt.err (!%p1486_p12)
}
 0x783   :  { %s1490_s16 = scalar_lea.hbm %s2157_s8, 256 }
 0x784   :  { %p1491_p13 = scmp.ne.s32.totalorder %s2157_s8, %s1490_s16  ;;  %p1494_p0 = scmp.lt.u32.totalorder %s1490_s16, %s2157_s8 }
 0x786   :  { %p1496_p1 = pnand %p1494_p0, %p1491_p13 }
 0x788   :  { %1499 = shalt.err (!%p1496_p1)
}
 0x789   :  { %1386 = dma.vmem_to_hbm [thread:$0]  %s1384_s7, 256, %s2157_s8, [#allocation6]  }
 0x78a   :  { %1502 = dma.done.wait [#allocation6], 256  }
 0x78b   :  { %1503 = vsyncadd [#allocation6], 4294967040 }
 0x78c   :  { %1390 = vsyncpa [#allocation5], 1 }
 0x78d   :  { %1391 = vsyncpa [#allocation6], 1 }

</bundles_post_ra>
